<compile_context>
chip_gen: v6e
topology: v6e:2x2x1
jax: 0.10.0
libtpu: 0.0.40
codegen_flags: <defaults>
</compile_context>

<pallas_src>
import math
from functools import partial

import numpy as np
import jax
import jax.numpy as jnp
from jax.experimental import pallas as pl
from jax.experimental.pallas import tpu as pltpu


# -----------------------------------------------------------------------------
# Fused kernel: all encoder layers for one batch element.
#   grid = (B, L); the layer axis carries the activation in a VMEM scratch.
# -----------------------------------------------------------------------------
def encoder_stack_kernel(x_ref,
                         wqkv_ref, bqkv_ref, wo_ref, bo_ref, g1_ref, be1_ref,
                         w1_ref, b1_ref, w2_ref, b2_ref, g2_ref, be2_ref,
                         o_ref, act_ref, *, heads):
    l = pl.program_id(1)

    # Load the embedded input into the carried activation at layer 0.
    @pl.when(l == 0)
    def _():
        act_ref[...] = x_ref[0].astype(jnp.float32)

    x = act_ref[...]                                     # (S, D) f32
    S, D = x.shape
    dk = D // heads
    x_bf = x.astype(jnp.bfloat16)                        # single bf16 cast per layer

    # ---- fused QKV projection: one lane-dense (S,D)@(D,3D) MXU dot ----------
    # (1/sqrt(dk) already folded into the Q columns of wqkv/bqkv.)
    qkv = jnp.dot(x_bf, wqkv_ref[0],
                  preferred_element_type=jnp.float32) + bqkv_ref[0]   # (S, 3D)

    # ---- per-head scaled dot-product attention (softmax in f32) -------------
    # TODO(synk): attention-mask path (mask is None in this Encoder forward).
    ctx_parts = []
    for h in range(heads):                               # static unroll, H small
        q_h = qkv[:, h * dk:(h + 1) * dk].astype(jnp.bfloat16)          # (S, dk)
        k_h = qkv[:, D + h * dk:D + (h + 1) * dk].astype(jnp.bfloat16)
        v_h = qkv[:, 2 * D + h * dk:2 * D + (h + 1) * dk].astype(jnp.bfloat16)
        s = jnp.einsum('qd,kd->qk', q_h, k_h,
                       preferred_element_type=jnp.float32)              # (S, S)
        m = jnp.max(s, axis=-1, keepdims=True)
        e = jnp.exp(s - m)
        p = e * pl.reciprocal(jnp.sum(e, axis=-1, keepdims=True), approx=True)
        ctx_parts.append(jnp.dot(p.astype(jnp.bfloat16), v_h,
                                 preferred_element_type=jnp.float32))   # (S, dk)
    ctx = jnp.concatenate(ctx_parts, axis=-1)            # (S, D) f32

    # ---- output projection + residual + LayerNorm1 ---------------------------
    attn = jnp.dot(ctx.astype(jnp.bfloat16), wo_ref[0],
                   preferred_element_type=jnp.float32) + bo_ref[0]
    r1 = x + attn
    mu1 = jnp.mean(r1, axis=-1, keepdims=True)
    v1 = jnp.mean((r1 - mu1) ** 2, axis=-1, keepdims=True)
    x1 = (r1 - mu1) * jax.lax.rsqrt(v1 + 1e-5) * g1_ref[0] + be1_ref[0]

    # ---- feed-forward + residual + LayerNorm2 (dropout = identity) ----------
    h1 = jnp.dot(x1.astype(jnp.bfloat16), w1_ref[0],
                 preferred_element_type=jnp.float32) + b1_ref[0]
    h1 = jnp.maximum(h1, 0.0)                            # ReLU
    ff = jnp.dot(h1.astype(jnp.bfloat16), w2_ref[0],
                 preferred_element_type=jnp.float32) + b2_ref[0]
    r2 = x1 + ff
    mu2 = jnp.mean(r2, axis=-1, keepdims=True)
    v2 = jnp.mean((r2 - mu2) ** 2, axis=-1, keepdims=True)
    x2 = (r2 - mu2) * jax.lax.rsqrt(v2 + 1e-5) * g2_ref[0] + be2_ref[0]

    act_ref[...] = x2                                    # carry to next layer

    @pl.when(l == pl.num_programs(1) - 1)
    def _():
        o_ref[0] = x2.astype(o_ref.dtype)


def encoder_stack(x, sp, heads):
    """x: (B, S, D) embedded+positional activations; sp: stacked layer params."""
    B, S, D = x.shape
    L = sp['wqkv'].shape[0]
    F = sp['w1'].shape[-1]

    act_spec = pl.BlockSpec((1, S, D), lambda b, l: (b, 0, 0))

    def lspec(*shape):
        # Per-layer parameter slice selected by the layer grid index (pipelined
        # across the "arbitrary" layer axis -> next-layer weight prefetch).
        return pl.BlockSpec((1,) + shape, lambda b, l: (l, 0, 0))

    return pl.pallas_call(
        partial(encoder_stack_kernel, heads=heads),
        out_shape=jax.ShapeDtypeStruct((B, S, D), x.dtype),
        grid_spec=pltpu.PrefetchScalarGridSpec(
            num_scalar_prefetch=0,
            grid=(B, L),
            in_specs=[act_spec,
                      lspec(D, 3 * D), lspec(1, 3 * D),
                      lspec(D, D),     lspec(1, D),
                      lspec(1, D),     lspec(1, D),
                      lspec(D, F),     lspec(1, F),
                      lspec(F, D),     lspec(1, D),
                      lspec(1, D),     lspec(1, D)],
            out_specs=act_spec,
            scratch_shapes=[pltpu.VMEM((S, D), jnp.float32)]),
        compiler_params=pltpu.CompilerParams(
            dimension_semantics=("parallel", "arbitrary"),
            vmem_limit_bytes=32 * 1024 * 1024),
    )(x, sp['wqkv'], sp['bqkv'], sp['wo'], sp['bo'], sp['g1'], sp['be1'],
      sp['w1'], sp['b1'], sp['w2'], sp['b2'], sp['g2'], sp['be2'])


# -----------------------------------------------------------------------------
# Parameter prep: fuse QKV (with the 1/sqrt(dk) scale folded into Q), cast the
# matmul weights to bf16, and stack all layers on a leading axis.
# -----------------------------------------------------------------------------
def prepare_stacked_params(layer_params, heads):
    d_model = layer_params[0]['wq'].shape[0]
    scale = 1.0 / math.sqrt(d_model // heads)

    wqkv = [jnp.concatenate([p['wq'] * scale, p['wk'], p['wv']], axis=1)
            for p in layer_params]
    bqkv = [jnp.concatenate([p['bq'] * scale, p['bk'], p['bv']], axis=1)
            for p in layer_params]

    def stack(name, dtype=None):
        a = jnp.stack([p[name] for p in layer_params])
        return a.astype(dtype) if dtype is not None else a

    return {
        'wqkv': jnp.stack(wqkv).astype(jnp.bfloat16),     # (L, D, 3D)
        'bqkv': jnp.stack(bqkv),                          # (L, 1, 3D) f32
        'wo': stack('wo', jnp.bfloat16), 'bo': stack('bo'),
        'g1': stack('g1'), 'be1': stack('be1'),
        'w1': stack('w1', jnp.bfloat16), 'b1': stack('b1'),
        'w2': stack('w2', jnp.bfloat16), 'b2': stack('b2'),
        'g2': stack('g2'), 'be2': stack('be2'),
    }


def make_positional_encoding(max_len, embed_size):
    # Vectorized, computed ONCE; faithful to the PyTorch double loop
    # (sin uses exponent 2*i/D, cos uses 2*(i+1)/D).
    pos = np.arange(max_len, dtype=np.float32)[:, None]
    i = np.arange(0, embed_size, 2, dtype=np.float32)[None, :]
    pe = np.zeros((max_len, embed_size), dtype=np.float32)
    pe[:, 0::2] = np.sin(pos / 10000.0 ** (2.0 * i / embed_size))
    pe[:, 1::2] = np.cos(pos / 10000.0 ** (2.0 * (i + 1.0) / embed_size))
    return jnp.asarray(pe)[None]                          # (1, L, D)


def encoder_forward(token_ids, emb_table, pe_table, stacked_params, heads):
    # Token-embedding gather + positional encoding (plain-JAX glue).
    # TODO(synk): fold the gather + PE add into the fused kernel via scalar-
    #             prefetched token ids (pl.Element row gather) if launch-bound.
    x = jnp.take(emb_table, token_ids, axis=0)            # (B, S, D)
    x = x + pe_table[:, :token_ids.shape[1]]
    # Dropout after positional encoding is identity in inference mode.
    return encoder_stack(x, stacked_params, heads)


# -----------------------------------------------------------------------------
# Parameter init (deterministic, same shapes/roles as the PyTorch module)
# -----------------------------------------------------------------------------
def init_layer_params(key, d_model, d_ff):
    ks = jax.random.split(key, 6)
    s = 0.02

    def w(k, fan_in, fan_out):
        return jax.random.normal(k, (fan_in, fan_out), jnp.float32) * s

    return {
        'wq': w(ks[0], d_model, d_model), 'bq': jnp.zeros((1, d_model), jnp.float32),
        'wk': w(ks[1], d_model, d_model), 'bk': jnp.zeros((1, d_model), jnp.float32),
        'wv': w(ks[2], d_model, d_model), 'bv': jnp.zeros((1, d_model), jnp.float32),
        'wo': w(ks[3], d_model, d_model), 'bo': jnp.zeros((1, d_model), jnp.float32),
        'g1': jnp.ones((1, d_model), jnp.float32), 'be1': jnp.zeros((1, d_model), jnp.float32),
        'w1': w(ks[4], d_model, d_ff), 'b1': jnp.zeros((1, d_ff), jnp.float32),
        'w2': w(ks[5], d_ff, d_model), 'b2': jnp.zeros((1, d_model), jnp.float32),
        'g2': jnp.ones((1, d_model), jnp.float32), 'be2': jnp.zeros((1, d_model), jnp.float32),
    }


if __name__ == "__main__":
    # Small but lane-friendly config (d_model multiple of 128, d_ff of 256).
    vocab_size, d_model, N, heads, d_ff = 50, 128, 2, 4, 256
    B, S = 2, 16

    key = jax.random.PRNGKey(0)
    k_emb, k_tok, k_layers = jax.random.split(key, 3)

    emb_table = jax.random.normal(k_emb, (vocab_size, d_model), jnp.float32) * 0.02
    token_ids = jax.random.randint(k_tok, (B, S), 0, vocab_size)
    layer_keys = jax.random.split(k_layers, N)
    layer_params = [init_layer_params(layer_keys[i], d_model, d_ff) for i in range(N)]
    stacked_params = prepare_stacked_params(layer_params, heads)
    pe_table = make_positional_encoding(512, d_model)      # PyTorch max_len=512

    out = encoder_forward(token_ids, emb_table, pe_table, stacked_params, heads)
    out = jax.block_until_ready(out)
    assert out.shape == (B, S, d_model)
    assert bool(jnp.all(jnp.isfinite(out)))
    print("KERNEL_OK")
</pallas_src>

<mosaic_0001>
module attributes {stable_mosaic.version = 11 : i64} {
  func.func @encoder_stack_kernel(%arg0: i32, %arg1: i32, %arg2: memref<1x16x128xf32, #tpu.memory_space<vmem>>, %arg3: memref<1x128x384xbf16, #tpu.memory_space<vmem>>, %arg4: memref<1x1x384xf32, #tpu.memory_space<vmem>>, %arg5: memref<1x128x128xbf16, #tpu.memory_space<vmem>>, %arg6: memref<1x1x128xf32, #tpu.memory_space<vmem>>, %arg7: memref<1x1x128xf32, #tpu.memory_space<vmem>>, %arg8: memref<1x1x128xf32, #tpu.memory_space<vmem>>, %arg9: memref<1x128x256xbf16, #tpu.memory_space<vmem>>, %arg10: memref<1x1x256xf32, #tpu.memory_space<vmem>>, %arg11: memref<1x256x128xbf16, #tpu.memory_space<vmem>>, %arg12: memref<1x1x128xf32, #tpu.memory_space<vmem>>, %arg13: memref<1x1x128xf32, #tpu.memory_space<vmem>>, %arg14: memref<1x1x128xf32, #tpu.memory_space<vmem>>, %arg15: memref<1x16x128xf32, #tpu.memory_space<vmem>>, %arg16: memref<16x128xf32, #tpu.memory_space<vmem>>) attributes {dimension_semantics = [#tpu.dimension_semantics<parallel>, #tpu.dimension_semantics<arbitrary>], iteration_bounds = array<i64: 2, 2>, scalar_prefetch = 0 : i64, scratch_operands = 1 : i64, tpu.core_type = #tpu.core_type<tc>, window_params = [{transform_indices = @transform_0, window_bounds = array<i64: 1, 16, 128>}, {transform_indices = @transform_1, window_bounds = array<i64: 1, 128, 384>}, {transform_indices = @transform_2, window_bounds = array<i64: 1, 1, 384>}, {transform_indices = @transform_3, window_bounds = array<i64: 1, 128, 128>}, {transform_indices = @transform_4, window_bounds = array<i64: 1, 1, 128>}, {transform_indices = @transform_5, window_bounds = array<i64: 1, 1, 128>}, {transform_indices = @transform_6, window_bounds = array<i64: 1, 1, 128>}, {transform_indices = @transform_7, window_bounds = array<i64: 1, 128, 256>}, {transform_indices = @transform_8, window_bounds = array<i64: 1, 1, 256>}, {transform_indices = @transform_9, window_bounds = array<i64: 1, 256, 128>}, {transform_indices = @transform_10, window_bounds = array<i64: 1, 1, 128>}, {transform_indices = @transform_11, window_bounds = array<i64: 1, 1, 128>}, {transform_indices = @transform_12, window_bounds = array<i64: 1, 1, 128>}, {transform_indices = @transform_13, window_bounds = array<i64: 1, 16, 128>}]} {
    %c0_i32 = arith.constant 0 : i32
    %0 = arith.cmpi eq, %arg1, %c0_i32 : i32
    %1 = arith.extui %0 : i1 to i32
    %c0_i32_0 = arith.constant 0 : i32
    %2 = arith.cmpi ne, %1, %c0_i32_0 : i32
    scf.if %2 {
      %c0_71 = arith.constant 0 : index
      %c0_72 = arith.constant 0 : index
      %c0_73 = arith.constant 0 : index
      %173 = vector.load %arg2[%c0_71, %c0_72, %c0_73] : memref<1x16x128xf32, #tpu.memory_space<vmem>>, vector<1x16x128xf32>
      %174 = vector.shape_cast %173 : vector<1x16x128xf32> to vector<16x128xf32>
      %c0_74 = arith.constant 0 : index
      %c0_75 = arith.constant 0 : index
      %175 = vector.load %arg16[%c0_74, %c0_75] : memref<16x128xf32, #tpu.memory_space<vmem>>, vector<16x128xf32>
      tpu.vector_store %arg16[%c0_74, %c0_75], %174 {strides = array<i32>} : memref<16x128xf32, #tpu.memory_space<vmem>>, vector<16x128xf32>,
    } else {
    }
    %c0 = arith.constant 0 : index
    %c0_1 = arith.constant 0 : index
    %3 = vector.load %arg16[%c0, %c0_1] : memref<16x128xf32, #tpu.memory_space<vmem>>, vector<16x128xf32>
    %4 = arith.truncf %3 : vector<16x128xf32> to vector<16x128xbf16>
    %c0_2 = arith.constant 0 : index
    %c0_3 = arith.constant 0 : index
    %c0_4 = arith.constant 0 : index
    %5 = vector.load %arg3[%c0_2, %c0_3, %c0_4] : memref<1x128x384xbf16, #tpu.memory_space<vmem>>, vector<1x128x384xbf16>
    %6 = vector.shape_cast %5 : vector<1x128x384xbf16> to vector<128x384xbf16>
    %cst = arith.constant dense<0.000000e+00> : vector<16x384xf32>
    %7 = tpu.matmul %4, %6, %cst {dimension_numbers = #tpu.dot_dimension_numbers<[1], [0], [0], [1], [0, 0, 1, 1], [], []>} : vector<16x128xbf16>, vector<128x384xbf16>, vector<16x384xf32> -> vector<16x384xf32>
    %c0_5 = arith.constant 0 : index
    %c0_6 = arith.constant 0 : index
    %c0_7 = arith.constant 0 : index
    %8 = vector.load %arg4[%c0_5, %c0_6, %c0_7] : memref<1x1x384xf32, #tpu.memory_space<vmem>>, vector<1x1x384xf32>
    %9 = vector.shape_cast %8 : vector<1x1x384xf32> to vector<1x384xf32>
    %10 = vector.broadcast %9 : vector<1x384xf32> to vector<16x384xf32>
    %11 = arith.addf %7, %10 : vector<16x384xf32>
    %12 = vector.extract_strided_slice %11 {offsets = [0, 0], sizes = [16, 32], strides = [1, 1]} : vector<16x384xf32> to vector<16x32xf32>
    %13 = arith.truncf %12 : vector<16x32xf32> to vector<16x32xbf16>
    %14 = vector.extract_strided_slice %11 {offsets = [0, 128], sizes = [16, 32], strides = [1, 1]} : vector<16x384xf32> to vector<16x32xf32>
    %15 = arith.truncf %14 : vector<16x32xf32> to vector<16x32xbf16>
    %16 = vector.extract_strided_slice %11 {offsets = [0, 256], sizes = [16, 32], strides = [1, 1]} : vector<16x384xf32> to vector<16x32xf32>
    %17 = arith.truncf %16 : vector<16x32xf32> to vector<16x32xbf16>
    "tpu.trace_start"() <{level = 10 : i32, message = "qd,kd->qk"}> : () -> ()
    %cst_8 = arith.constant dense<0.000000e+00> : vector<16x16xf32>
    %18 = tpu.matmul %13, %15, %cst_8 {dimension_numbers = #tpu.dot_dimension_numbers<[1], [1], [0], [0], [0, 0, 1, 0], [], []>} : vector<16x32xbf16>, vector<16x32xbf16>, vector<16x16xf32> -> vector<16x16xf32>
    "tpu.trace_stop"() : () -> ()
    %cst_9 = arith.constant dense<0xFF800000> : vector<16xf32>
    %19 = vector.multi_reduction <maximumf>, %18, %cst_9 [1] : vector<16x16xf32> to vector<16xf32>
    %20 = vector.shape_cast %19 : vector<16xf32> to vector<16x1xf32>
    %21 = vector.broadcast %20 : vector<16x1xf32> to vector<16x16xf32>
    %22 = arith.subf %18, %21 : vector<16x16xf32>
    %23 = math.exp %22 : vector<16x16xf32>
    %cst_10 = arith.constant dense<0.000000e+00> : vector<16xf32>
    %24 = vector.multi_reduction <add>, %23, %cst_10 [1] : vector<16x16xf32> to vector<16xf32>
    %25 = vector.shape_cast %24 : vector<16xf32> to vector<16x1xf32>
    %26 = tpu.reciprocal %25 {approx = true} : vector<16x1xf32> -> vector<16x1xf32>
    %27 = vector.broadcast %26 : vector<16x1xf32> to vector<16x16xf32>
    %28 = arith.mulf %23, %27 : vector<16x16xf32>
    %29 = arith.truncf %28 : vector<16x16xf32> to vector<16x16xbf16>
    %cst_11 = arith.constant dense<0.000000e+00> : vector<16x32xf32>
    %30 = tpu.matmul %29, %17, %cst_11 {dimension_numbers = #tpu.dot_dimension_numbers<[1], [0], [0], [1], [0, 0, 1, 1], [], []>} : vector<16x16xbf16>, vector<16x32xbf16>, vector<16x32xf32> -> vector<16x32xf32>
    %31 = vector.extract_strided_slice %11 {offsets = [0, 32], sizes = [16, 32], strides = [1, 1]} : vector<16x384xf32> to vector<16x32xf32>
    %32 = arith.truncf %31 : vector<16x32xf32> to vector<16x32xbf16>
    %33 = vector.extract_strided_slice %11 {offsets = [0, 160], sizes = [16, 32], strides = [1, 1]} : vector<16x384xf32> to vector<16x32xf32>
    %34 = arith.truncf %33 : vector<16x32xf32> to vector<16x32xbf16>
    %35 = vector.extract_strided_slice %11 {offsets = [0, 288], sizes = [16, 32], strides = [1, 1]} : vector<16x384xf32> to vector<16x32xf32>
    %36 = arith.truncf %35 : vector<16x32xf32> to vector<16x32xbf16>
    "tpu.trace_start"() <{level = 10 : i32, message = "qd,kd->qk"}> : () -> ()
    %cst_12 = arith.constant dense<0.000000e+00> : vector<16x16xf32>
    %37 = tpu.matmul %32, %34, %cst_12 {dimension_numbers = #tpu.dot_dimension_numbers<[1], [1], [0], [0], [0, 0, 1, 0], [], []>} : vector<16x32xbf16>, vector<16x32xbf16>, vector<16x16xf32> -> vector<16x16xf32>
    "tpu.trace_stop"() : () -> ()
    %cst_13 = arith.constant dense<0xFF800000> : vector<16xf32>
    %38 = vector.multi_reduction <maximumf>, %37, %cst_13 [1] : vector<16x16xf32> to vector<16xf32>
    %39 = vector.shape_cast %38 : vector<16xf32> to vector<16x1xf32>
    %40 = vector.broadcast %39 : vector<16x1xf32> to vector<16x16xf32>
    %41 = arith.subf %37, %40 : vector<16x16xf32>
    %42 = math.exp %41 : vector<16x16xf32>
    %cst_14 = arith.constant dense<0.000000e+00> : vector<16xf32>
    %43 = vector.multi_reduction <add>, %42, %cst_14 [1] : vector<16x16xf32> to vector<16xf32>
    %44 = vector.shape_cast %43 : vector<16xf32> to vector<16x1xf32>
    %45 = tpu.reciprocal %44 {approx = true} : vector<16x1xf32> -> vector<16x1xf32>
    %46 = vector.broadcast %45 : vector<16x1xf32> to vector<16x16xf32>
    %47 = arith.mulf %42, %46 : vector<16x16xf32>
    %48 = arith.truncf %47 : vector<16x16xf32> to vector<16x16xbf16>
    %cst_15 = arith.constant dense<0.000000e+00> : vector<16x32xf32>
    %49 = tpu.matmul %48, %36, %cst_15 {dimension_numbers = #tpu.dot_dimension_numbers<[1], [0], [0], [1], [0, 0, 1, 1], [], []>} : vector<16x16xbf16>, vector<16x32xbf16>, vector<16x32xf32> -> vector<16x32xf32>
    %50 = vector.extract_strided_slice %11 {offsets = [0, 64], sizes = [16, 32], strides = [1, 1]} : vector<16x384xf32> to vector<16x32xf32>
    %51 = arith.truncf %50 : vector<16x32xf32> to vector<16x32xbf16>
    %52 = vector.extract_strided_slice %11 {offsets = [0, 192], sizes = [16, 32], strides = [1, 1]} : vector<16x384xf32> to vector<16x32xf32>
    %53 = arith.truncf %52 : vector<16x32xf32> to vector<16x32xbf16>
    %54 = vector.extract_strided_slice %11 {offsets = [0, 320], sizes = [16, 32], strides = [1, 1]} : vector<16x384xf32> to vector<16x32xf32>
    %55 = arith.truncf %54 : vector<16x32xf32> to vector<16x32xbf16>
    "tpu.trace_start"() <{level = 10 : i32, message = "qd,kd->qk"}> : () -> ()
    %cst_16 = arith.constant dense<0.000000e+00> : vector<16x16xf32>
    %56 = tpu.matmul %51, %53, %cst_16 {dimension_numbers = #tpu.dot_dimension_numbers<[1], [1], [0], [0], [0, 0, 1, 0], [], []>} : vector<16x32xbf16>, vector<16x32xbf16>, vector<16x16xf32> -> vector<16x16xf32>
    "tpu.trace_stop"() : () -> ()
    %cst_17 = arith.constant dense<0xFF800000> : vector<16xf32>
    %57 = vector.multi_reduction <maximumf>, %56, %cst_17 [1] : vector<16x16xf32> to vector<16xf32>
    %58 = vector.shape_cast %57 : vector<16xf32> to vector<16x1xf32>
    %59 = vector.broadcast %58 : vector<16x1xf32> to vector<16x16xf32>
    %60 = arith.subf %56, %59 : vector<16x16xf32>
    %61 = math.exp %60 : vector<16x16xf32>
    %cst_18 = arith.constant dense<0.000000e+00> : vector<16xf32>
    %62 = vector.multi_reduction <add>, %61, %cst_18 [1] : vector<16x16xf32> to vector<16xf32>
    %63 = vector.shape_cast %62 : vector<16xf32> to vector<16x1xf32>
    %64 = tpu.reciprocal %63 {approx = true} : vector<16x1xf32> -> vector<16x1xf32>
    %65 = vector.broadcast %64 : vector<16x1xf32> to vector<16x16xf32>
    %66 = arith.mulf %61, %65 : vector<16x16xf32>
    %67 = arith.truncf %66 : vector<16x16xf32> to vector<16x16xbf16>
    %cst_19 = arith.constant dense<0.000000e+00> : vector<16x32xf32>
    %68 = tpu.matmul %67, %55, %cst_19 {dimension_numbers = #tpu.dot_dimension_numbers<[1], [0], [0], [1], [0, 0, 1, 1], [], []>} : vector<16x16xbf16>, vector<16x32xbf16>, vector<16x32xf32> -> vector<16x32xf32>
    %69 = vector.extract_strided_slice %11 {offsets = [0, 96], sizes = [16, 32], strides = [1, 1]} : vector<16x384xf32> to vector<16x32xf32>
    %70 = arith.truncf %69 : vector<16x32xf32> to vector<16x32xbf16>
    %71 = vector.extract_strided_slice %11 {offsets = [0, 224], sizes = [16, 32], strides = [1, 1]} : vector<16x384xf32> to vector<16x32xf32>
    %72 = arith.truncf %71 : vector<16x32xf32> to vector<16x32xbf16>
    %73 = vector.extract_strided_slice %11 {offsets = [0, 352], sizes = [16, 32], strides = [1, 1]} : vector<16x384xf32> to vector<16x32xf32>
    %74 = arith.truncf %73 : vector<16x32xf32> to vector<16x32xbf16>
    "tpu.trace_start"() <{level = 10 : i32, message = "qd,kd->qk"}> : () -> ()
    %cst_20 = arith.constant dense<0.000000e+00> : vector<16x16xf32>
    %75 = tpu.matmul %70, %72, %cst_20 {dimension_numbers = #tpu.dot_dimension_numbers<[1], [1], [0], [0], [0, 0, 1, 0], [], []>} : vector<16x32xbf16>, vector<16x32xbf16>, vector<16x16xf32> -> vector<16x16xf32>
    "tpu.trace_stop"() : () -> ()
    %cst_21 = arith.constant dense<0xFF800000> : vector<16xf32>
    %76 = vector.multi_reduction <maximumf>, %75, %cst_21 [1] : vector<16x16xf32> to vector<16xf32>
    %77 = vector.shape_cast %76 : vector<16xf32> to vector<16x1xf32>
    %78 = vector.broadcast %77 : vector<16x1xf32> to vector<16x16xf32>
    %79 = arith.subf %75, %78 : vector<16x16xf32>
    %80 = math.exp %79 : vector<16x16xf32>
    %cst_22 = arith.constant dense<0.000000e+00> : vector<16xf32>
    %81 = vector.multi_reduction <add>, %80, %cst_22 [1] : vector<16x16xf32> to vector<16xf32>
    %82 = vector.shape_cast %81 : vector<16xf32> to vector<16x1xf32>
    %83 = tpu.reciprocal %82 {approx = true} : vector<16x1xf32> -> vector<16x1xf32>
    %84 = vector.broadcast %83 : vector<16x1xf32> to vector<16x16xf32>
    %85 = arith.mulf %80, %84 : vector<16x16xf32>
    %86 = arith.truncf %85 : vector<16x16xf32> to vector<16x16xbf16>
    %cst_23 = arith.constant dense<0.000000e+00> : vector<16x32xf32>
    %87 = tpu.matmul %86, %74, %cst_23 {dimension_numbers = #tpu.dot_dimension_numbers<[1], [0], [0], [1], [0, 0, 1, 1], [], []>} : vector<16x16xbf16>, vector<16x32xbf16>, vector<16x32xf32> -> vector<16x32xf32>
    %88 = tpu.concatenate %30, %49, %68, %87 in 1 : vector<16x32xf32>, vector<16x32xf32>, vector<16x32xf32>, vector<16x32xf32> -> vector<16x128xf32>
    %89 = arith.truncf %88 : vector<16x128xf32> to vector<16x128xbf16>
    %c0_24 = arith.constant 0 : index
    %c0_25 = arith.constant 0 : index
    %c0_26 = arith.constant 0 : index
    %90 = vector.load %arg5[%c0_24, %c0_25, %c0_26] : memref<1x128x128xbf16, #tpu.memory_space<vmem>>, vector<1x128x128xbf16>
    %91 = vector.shape_cast %90 : vector<1x128x128xbf16> to vector<128x128xbf16>
    %cst_27 = arith.constant dense<0.000000e+00> : vector<16x128xf32>
    %92 = tpu.matmul %89, %91, %cst_27 {dimension_numbers = #tpu.dot_dimension_numbers<[1], [0], [0], [1], [0, 0, 1, 1], [], []>} : vector<16x128xbf16>, vector<128x128xbf16>, vector<16x128xf32> -> vector<16x128xf32>
    %c0_28 = arith.constant 0 : index
    %c0_29 = arith.constant 0 : index
    %c0_30 = arith.constant 0 : index
    %93 = vector.load %arg6[%c0_28, %c0_29, %c0_30] : memref<1x1x128xf32, #tpu.memory_space<vmem>>, vector<1x1x128xf32>
    %94 = vector.shape_cast %93 : vector<1x1x128xf32> to vector<1x128xf32>
    %95 = vector.broadcast %94 : vector<1x128xf32> to vector<16x128xf32>
    %96 = arith.addf %92, %95 : vector<16x128xf32>
    %97 = arith.addf %3, %96 : vector<16x128xf32>
    %cst_31 = arith.constant dense<0.000000e+00> : vector<16xf32>
    %98 = vector.multi_reduction <add>, %97, %cst_31 [1] : vector<16x128xf32> to vector<16xf32>
    %99 = vector.shape_cast %98 : vector<16xf32> to vector<16x1xf32>
    %cst_32 = arith.constant 1.280000e+02 : f32
    %100 = vector.broadcast %cst_32 : f32 to vector<16x1xf32>
    %101 = arith.divf %99, %100 : vector<16x1xf32>
    %102 = vector.broadcast %101 : vector<16x1xf32> to vector<16x128xf32>
    %103 = arith.subf %97, %102 : vector<16x128xf32>
    %104 = arith.mulf %103, %103 : vector<16x128xf32>
    %cst_33 = arith.constant dense<0.000000e+00> : vector<16xf32>
    %105 = vector.multi_reduction <add>, %104, %cst_33 [1] : vector<16x128xf32> to vector<16xf32>
    %106 = vector.shape_cast %105 : vector<16xf32> to vector<16x1xf32>
    %cst_34 = arith.constant 1.280000e+02 : f32
    %107 = vector.broadcast %cst_34 : f32 to vector<16x1xf32>
    %108 = arith.divf %106, %107 : vector<16x1xf32>
    %109 = vector.broadcast %101 : vector<16x1xf32> to vector<16x128xf32>
    %110 = arith.subf %97, %109 : vector<16x128xf32>
    %cst_35 = arith.constant 9.99999974E-6 : f32
    %111 = vector.broadcast %cst_35 : f32 to vector<16x1xf32>
    %112 = arith.addf %108, %111 : vector<16x1xf32>
    %113 = math.rsqrt %112 : vector<16x1xf32>
    %114 = vector.broadcast %113 : vector<16x1xf32> to vector<16x128xf32>
    %115 = arith.mulf %110, %114 : vector<16x128xf32>
    %c0_36 = arith.constant 0 : index
    %c0_37 = arith.constant 0 : index
    %c0_38 = arith.constant 0 : index
    %116 = vector.load %arg7[%c0_36, %c0_37, %c0_38] : memref<1x1x128xf32, #tpu.memory_space<vmem>>, vector<1x1x128xf32>
    %117 = vector.shape_cast %116 : vector<1x1x128xf32> to vector<1x128xf32>
    %118 = vector.broadcast %117 : vector<1x128xf32> to vector<16x128xf32>
    %119 = arith.mulf %115, %118 : vector<16x128xf32>
    %c0_39 = arith.constant 0 : index
    %c0_40 = arith.constant 0 : index
    %c0_41 = arith.constant 0 : index
    %120 = vector.load %arg8[%c0_39, %c0_40, %c0_41] : memref<1x1x128xf32, #tpu.memory_space<vmem>>, vector<1x1x128xf32>
    %121 = vector.shape_cast %120 : vector<1x1x128xf32> to vector<1x128xf32>
    %122 = vector.broadcast %121 : vector<1x128xf32> to vector<16x128xf32>
    %123 = arith.addf %119, %122 : vector<16x128xf32>
    %124 = arith.truncf %123 : vector<16x128xf32> to vector<16x128xbf16>
    %c0_42 = arith.constant 0 : index
    %c0_43 = arith.constant 0 : index
    %c0_44 = arith.constant 0 : index
    %125 = vector.load %arg9[%c0_42, %c0_43, %c0_44] : memref<1x128x256xbf16, #tpu.memory_space<vmem>>, vector<1x128x256xbf16>
    %126 = vector.shape_cast %125 : vector<1x128x256xbf16> to vector<128x256xbf16>
    %cst_45 = arith.constant dense<0.000000e+00> : vector<16x256xf32>
    %127 = tpu.matmul %124, %126, %cst_45 {dimension_numbers = #tpu.dot_dimension_numbers<[1], [0], [0], [1], [0, 0, 1, 1], [], []>} : vector<16x128xbf16>, vector<128x256xbf16>, vector<16x256xf32> -> vector<16x256xf32>
    %c0_46 = arith.constant 0 : index
    %c0_47 = arith.constant 0 : index
    %c0_48 = arith.constant 0 : index
    %128 = vector.load %arg10[%c0_46, %c0_47, %c0_48] : memref<1x1x256xf32, #tpu.memory_space<vmem>>, vector<1x1x256xf32>
    %129 = vector.shape_cast %128 : vector<1x1x256xf32> to vector<1x256xf32>
    %130 = vector.broadcast %129 : vector<1x256xf32> to vector<16x256xf32>
    %131 = arith.addf %127, %130 : vector<16x256xf32>
    %cst_49 = arith.constant 0.000000e+00 : f32
    %132 = vector.broadcast %cst_49 : f32 to vector<16x256xf32>
    %133 = arith.maximumf %131, %132 : vector<16x256xf32>
    %134 = arith.truncf %133 : vector<16x256xf32> to vector<16x256xbf16>
    %c0_50 = arith.constant 0 : index
    %c0_51 = arith.constant 0 : index
    %c0_52 = arith.constant 0 : index
    %135 = vector.load %arg11[%c0_50, %c0_51, %c0_52] : memref<1x256x128xbf16, #tpu.memory_space<vmem>>, vector<1x256x128xbf16>
    %136 = vector.shape_cast %135 : vector<1x256x128xbf16> to vector<256x128xbf16>
    %cst_53 = arith.constant dense<0.000000e+00> : vector<16x128xf32>
    %137 = tpu.matmul %134, %136, %cst_53 {dimension_numbers = #tpu.dot_dimension_numbers<[1], [0], [0], [1], [0, 0, 1, 1], [], []>} : vector<16x256xbf16>, vector<256x128xbf16>, vector<16x128xf32> -> vector<16x128xf32>
    %c0_54 = arith.constant 0 : index
    %c0_55 = arith.constant 0 : index
    %c0_56 = arith.constant 0 : index
    %138 = vector.load %arg12[%c0_54, %c0_55, %c0_56] : memref<1x1x128xf32, #tpu.memory_space<vmem>>, vector<1x1x128xf32>
    %139 = vector.shape_cast %138 : vector<1x1x128xf32> to vector<1x128xf32>
    %140 = vector.broadcast %139 : vector<1x128xf32> to vector<16x128xf32>
    %141 = arith.addf %137, %140 : vector<16x128xf32>
    %142 = arith.addf %123, %141 : vector<16x128xf32>
    %cst_57 = arith.constant dense<0.000000e+00> : vector<16xf32>
    %143 = vector.multi_reduction <add>, %142, %cst_57 [1] : vector<16x128xf32> to vector<16xf32>
    %144 = vector.shape_cast %143 : vector<16xf32> to vector<16x1xf32>
    %cst_58 = arith.constant 1.280000e+02 : f32
    %145 = vector.broadcast %cst_58 : f32 to vector<16x1xf32>
    %146 = arith.divf %144, %145 : vector<16x1xf32>
    %147 = vector.broadcast %146 : vector<16x1xf32> to vector<16x128xf32>
    %148 = arith.subf %142, %147 : vector<16x128xf32>
    %149 = arith.mulf %148, %148 : vector<16x128xf32>
    %cst_59 = arith.constant dense<0.000000e+00> : vector<16xf32>
    %150 = vector.multi_reduction <add>, %149, %cst_59 [1] : vector<16x128xf32> to vector<16xf32>
    %151 = vector.shape_cast %150 : vector<16xf32> to vector<16x1xf32>
    %cst_60 = arith.constant 1.280000e+02 : f32
    %152 = vector.broadcast %cst_60 : f32 to vector<16x1xf32>
    %153 = arith.divf %151, %152 : vector<16x1xf32>
    %154 = vector.broadcast %146 : vector<16x1xf32> to vector<16x128xf32>
    %155 = arith.subf %142, %154 : vector<16x128xf32>
    %cst_61 = arith.constant 9.99999974E-6 : f32
    %156 = vector.broadcast %cst_61 : f32 to vector<16x1xf32>
    %157 = arith.addf %153, %156 : vector<16x1xf32>
    %158 = math.rsqrt %157 : vector<16x1xf32>
    %159 = vector.broadcast %158 : vector<16x1xf32> to vector<16x128xf32>
    %160 = arith.mulf %155, %159 : vector<16x128xf32>
    %c0_62 = arith.constant 0 : index
    %c0_63 = arith.constant 0 : index
    %c0_64 = arith.constant 0 : index
    %161 = vector.load %arg13[%c0_62, %c0_63, %c0_64] : memref<1x1x128xf32, #tpu.memory_space<vmem>>, vector<1x1x128xf32>
    %162 = vector.shape_cast %161 : vector<1x1x128xf32> to vector<1x128xf32>
    %163 = vector.broadcast %162 : vector<1x128xf32> to vector<16x128xf32>
    %164 = arith.mulf %160, %163 : vector<16x128xf32>
    %c0_65 = arith.constant 0 : index
    %c0_66 = arith.constant 0 : index
    %c0_67 = arith.constant 0 : index
    %165 = vector.load %arg14[%c0_65, %c0_66, %c0_67] : memref<1x1x128xf32, #tpu.memory_space<vmem>>, vector<1x1x128xf32>
    %166 = vector.shape_cast %165 : vector<1x1x128xf32> to vector<1x128xf32>
    %167 = vector.broadcast %166 : vector<1x128xf32> to vector<16x128xf32>
    %168 = arith.addf %164, %167 : vector<16x128xf32>
    %c0_68 = arith.constant 0 : index
    %c0_69 = arith.constant 0 : index
    %169 = vector.load %arg16[%c0_68, %c0_69] : memref<16x128xf32, #tpu.memory_space<vmem>>, vector<16x128xf32>
    tpu.vector_store %arg16[%c0_68, %c0_69], %168 {strides = array<i32>} : memref<16x128xf32, #tpu.memory_space<vmem>>, vector<16x128xf32>,
    %c1_i32 = arith.constant 1 : i32
    %170 = arith.cmpi eq, %arg1, %c1_i32 : i32
    %171 = arith.extui %170 : i1 to i32
    %c0_i32_70 = arith.constant 0 : i32
    %172 = arith.cmpi ne, %171, %c0_i32_70 : i32
    scf.if %172 {
      %c0_71 = arith.constant 0 : index
      %c0_72 = arith.constant 0 : index
      %c0_73 = arith.constant 0 : index
      %173 = vector.load %arg15[%c0_71, %c0_72, %c0_73] : memref<1x16x128xf32, #tpu.memory_space<vmem>>, vector<1x16x128xf32>
      %174 = vector.shape_cast %173 : vector<1x16x128xf32> to vector<16x128xf32>
      %175 = vector.shape_cast %168 : vector<16x128xf32> to vector<1x16x128xf32>
      tpu.vector_store %arg15[%c0_71, %c0_72, %c0_73], %175 {strides = array<i32>} : memref<1x16x128xf32, #tpu.memory_space<vmem>>, vector<1x16x128xf32>,
    } else {
    }
    return
  }
  func.func @transform_0(%arg0: i32, %arg1: i32) -> (i32, i32, i32) {
    %c0_i32 = arith.constant 0 : i32
    %c0_i32_0 = arith.constant 0 : i32
    %c0_i32_1 = arith.constant 0 : i32
    return %arg0, %c0_i32, %c0_i32_0 : i32, i32, i32
  }
  func.func @transform_1(%arg0: i32, %arg1: i32) -> (i32, i32, i32) {
    %c0_i32 = arith.constant 0 : i32
    %c0_i32_0 = arith.constant 0 : i32
    %c0_i32_1 = arith.constant 0 : i32
    return %arg1, %c0_i32, %c0_i32_0 : i32, i32, i32
  }
  func.func @transform_2(%arg0: i32, %arg1: i32) -> (i32, i32, i32) {
    %c0_i32 = arith.constant 0 : i32
    %c0_i32_0 = arith.constant 0 : i32
    %c0_i32_1 = arith.constant 0 : i32
    return %arg1, %c0_i32, %c0_i32_0 : i32, i32, i32
  }
  func.func @transform_3(%arg0: i32, %arg1: i32) -> (i32, i32, i32) {
    %c0_i32 = arith.constant 0 : i32
    %c0_i32_0 = arith.constant 0 : i32
    %c0_i32_1 = arith.constant 0 : i32
    return %arg1, %c0_i32, %c0_i32_0 : i32, i32, i32
  }
  func.func @transform_4(%arg0: i32, %arg1: i32) -> (i32, i32, i32) {
    %c0_i32 = arith.constant 0 : i32
    %c0_i32_0 = arith.constant 0 : i32
    %c0_i32_1 = arith.constant 0 : i32
    return %arg1, %c0_i32, %c0_i32_0 : i32, i32, i32
  }
  func.func @transform_5(%arg0: i32, %arg1: i32) -> (i32, i32, i32) {
    %c0_i32 = arith.constant 0 : i32
    %c0_i32_0 = arith.constant 0 : i32
    %c0_i32_1 = arith.constant 0 : i32
    return %arg1, %c0_i32, %c0_i32_0 : i32, i32, i32
  }
  func.func @transform_6(%arg0: i32, %arg1: i32) -> (i32, i32, i32) {
    %c0_i32 = arith.constant 0 : i32
    %c0_i32_0 = arith.constant 0 : i32
    %c0_i32_1 = arith.constant 0 : i32
    return %arg1, %c0_i32, %c0_i32_0 : i32, i32, i32
  }
  func.func @transform_7(%arg0: i32, %arg1: i32) -> (i32, i32, i32) {
    %c0_i32 = arith.constant 0 : i32
    %c0_i32_0 = arith.constant 0 : i32
    %c0_i32_1 = arith.constant 0 : i32
    return %arg1, %c0_i32, %c0_i32_0 : i32, i32, i32
  }
  func.func @transform_8(%arg0: i32, %arg1: i32) -> (i32, i32, i32) {
    %c0_i32 = arith.constant 0 : i32
    %c0_i32_0 = arith.constant 0 : i32
    %c0_i32_1 = arith.constant 0 : i32
    return %arg1, %c0_i32, %c0_i32_0 : i32, i32, i32
  }
  func.func @transform_9(%arg0: i32, %arg1: i32) -> (i32, i32, i32) {
    %c0_i32 = arith.constant 0 : i32
    %c0_i32_0 = arith.constant 0 : i32
    %c0_i32_1 = arith.constant 0 : i32
    return %arg1, %c0_i32, %c0_i32_0 : i32, i32, i32
  }
  func.func @transform_10(%arg0: i32, %arg1: i32) -> (i32, i32, i32) {
    %c0_i32 = arith.constant 0 : i32
    %c0_i32_0 = arith.constant 0 : i32
    %c0_i32_1 = arith.constant 0 : i32
    return %arg1, %c0_i32, %c0_i32_0 : i32, i32, i32
  }
  func.func @transform_11(%arg0: i32, %arg1: i32) -> (i32, i32, i32) {
    %c0_i32 = arith.constant 0 : i32
    %c0_i32_0 = arith.constant 0 : i32
    %c0_i32_1 = arith.constant 0 : i32
    return %arg1, %c0_i32, %c0_i32_0 : i32, i32, i32
  }
  func.func @transform_12(%arg0: i32, %arg1: i32) -> (i32, i32, i32) {
    %c0_i32 = arith.constant 0 : i32
    %c0_i32_0 = arith.constant 0 : i32
    %c0_i32_1 = arith.constant 0 : i32
    return %arg1, %c0_i32, %c0_i32_0 : i32, i32, i32
  }
  func.func @transform_13(%arg0: i32, %arg1: i32) -> (i32, i32, i32) {
    %c0_i32 = arith.constant 0 : i32
    %c0_i32_0 = arith.constant 0 : i32
    %c0_i32_1 = arith.constant 0 : i32
    return %arg0, %c0_i32, %c0_i32_0 : i32, i32, i32
  }
}

</mosaic_0001>

<bundles_post_ra>
// kernel: tpu_custom_call.1
= control target key start
LH: loop header
LB: loop body
LE: loop exit
PB: predicated region body
PF: predicated region fallthrough
CT: control target
= control target key end

     0   :  { %s3922_s0 = inlined_call_operand.hbm [shape: f32[2,16,128], index: 0, kind: input, shape index: {}]   ;;  %s3923_s1 = inlined_call_operand.hbm [shape: bf16[2,128,384], index: 1, kind: input, shape index: {}]   ;;  %s3924_s2 = inlined_call_operand.hbm [shape: f32[2,1,384], index: 2, kind: input, shape index: {}]   ;;  %s3925_s3 = inlined_call_operand.hbm [shape: bf16[2,128,128], index: 3, kind: input, shape index: {}]   ;;  %s3926_s4 = inlined_call_operand.vmem [shape: f32[2,1,128], index: 4, kind: input, shape index: {}]   ;;  %s3927_s5 = inlined_call_operand.vmem [shape: f32[2,1,128], index: 5, kind: input, shape index: {}]   ;;  %s3928_s6 = inlined_call_operand.vmem [shape: f32[2,1,128], index: 6, kind: input, shape index: {}]   ;;  %s3929_s7 = inlined_call_operand.hbm [shape: bf16[2,128,256], index: 7, kind: input, shape index: {}]   ;;  %s3930_s8 = inlined_call_operand.vmem [shape: f32[2,1,256], index: 8, kind: input, shape index: {}]   ;;  %s3931_s9 = inlined_call_operand.hbm [shape: bf16[2,256,128], index: 9, kind: input, shape index: {}]   ;;  %s3932_s10 = inlined_call_operand.vmem [shape: f32[2,1,128], index: 10, kind: input, shape index: {}]   ;;  %s3933_s11 = inlined_call_operand.vmem [shape: f32[2,1,128], index: 11, kind: input, shape index: {}]   ;;  %s3934_s12 = inlined_call_operand.vmem [shape: f32[2,1,128], index: 12, kind: input, shape index: {}]   ;;  %s3935_s13 = inlined_call_operand.hbm [shape: f32[2,16,128], index: 13, kind: output, shape index: {}]  }
   0x1   :  { %3958 = sst [smem:[#allocation35_spill]] %s3922_s0 }
   0x2   :  { %3959 = sst [smem:[#allocation36_spill]] %s3923_s1 }
   0x3   :  { %3960 = sst [smem:[#allocation37_spill]] %s3924_s2 }
   0x4   :  { %3961 = sst [smem:[#allocation38_spill]] %s3925_s3 }
   0x5   :  { %3962 = sst [smem:[#allocation39_spill]] %s3926_s4 }
   0x6   :  { %3963 = sst [smem:[#allocation40_spill]] %s3927_s5 }
   0x7   :  { %3964 = sst [smem:[#allocation41_spill]] %s3928_s6 }
   0x8   :  { %3965 = sst [smem:[#allocation42_spill]] %s3929_s7 }
   0x9   :  { %3966 = sst [smem:[#allocation43_spill]] %s3930_s8 }
   0xa   :  { %3967 = sst [smem:[#allocation44_spill]] %s3931_s9 }
   0xb   :  { %3968 = sst [smem:[#allocation45_spill]] %s3932_s10 }
   0xc   :  { %3969 = sst [smem:[#allocation46_spill]] %s3933_s11 }
   0xd   :  { %3970 = sst [smem:[#allocation47_spill]] %s3934_s12 }
   0xe   :  { %3971 = sst [smem:[#allocation48_spill]] %s3935_s13 }
   0xf   :  { %18 = vsyncpa [#allocation4], 0 }
  0x10   :  { %20 = vsyncpa [#allocation4 + $0x1], 0 }
  0x11   :  { %21 = vsyncpa [#allocation7], 0 }
  0x12   :  { %23 = vsyncpa [#allocation7 + $0x1], 0 }
  0x13   :  { %24 = vsyncpa [#allocation10], 0 }
  0x14   :  { %26 = vsyncpa [#allocation10 + $0x1], 0 }
  0x15   :  { %27 = vsyncpa [#allocation13], 0 }
  0x16   :  { %29 = vsyncpa [#allocation13 + $0x1], 0 }
  0x17   :  { %30 = vsyncpa [#allocation5], 0 }
  0x18   :  { %32 = vsyncpa [#allocation5 + $0x1], 0  ;;  %s3301_s25 = smov 0   ;;  %s3303_s26 = smov 0  }
  0x19   :  { %s3305_s27 = smov 0   ;;  %s3307_s28 = smov 0  }
  0x1a   :  { %s3309_s29 = smov 0   ;;  %s3311_s30 = smov 0  }
  0x1b   :  { %s3313_s14 = smov 0   ;;  %s3315_s15 = smov 0  }
  0x1c   :  { %s3317_s16 = smov 0   ;;  %s3319_s17 = smov 0  }
  0x1d   :  { %s3321_s18 = smov 0  }
  0x1e LB: > { %3972 = sst [smem:[#allocation20_spill]] %s3172_s26  ;;  %p65_p0 = scmp.eq.s32.totalorder %s3208_s18, 0  ;;  %s3208_s18 = sphi %s3321_s18, %s38_s18   ;;  %s3204_s17 = sphi %s3319_s17, %s4043_s17   ;;  %s3200_s16 = sphi %s3317_s16, %s4042_s16   ;;  %s3196_s15 = sphi %s3315_s15, %s4041_s15   ;;  %s3192_s14 = sphi %s3313_s14, %s4040_s14   ;;  %s3188_s30 = sphi %s3311_s30, %s4039_s30   ;;  %s3184_s29 = sphi %s3309_s29, %s4038_s29   ;;  %s3180_s28 = sphi %s3307_s28, %s4037_s28   ;;  %s3176_s27 = sphi %s3305_s27, %s4036_s27   ;;  %s3172_s26 = sphi %s3303_s26, %s4035_s26   ;;  %s3168_s25 = sphi %s3301_s25, %s4034_s25  }
  0x1f   : > { %3973 = sst [smem:[#allocation21_spill]] %s3176_s27  ;;  %p90_p1 = scmp.ne.s32.totalorder %s3176_s27, %s3172_s26 }
  0x20   : > { %3974 = sst [smem:[#allocation22_spill]] %s3180_s28  ;;  %p96_p2 = scmp.ne.s32.totalorder %s3172_s26, %s3168_s25 }
  0x21   : > { %3975 = sst [smem:[#allocation23_spill]] %s3184_s29  ;;  %p3940_p3 = scmp.lt.s32.totalorder %s3208_s18, 4 }
  0x22   : > { %3976 = sst [smem:[#allocation24_spill]] %s3188_s30  ;;  %p92_p4 = por %p90_p1, %p65_p0 }
  0x23   : > { %3977 = sst [smem:[#allocation25_spill]] %s3192_s14  ;;  %s3937_s20 = sand.u32 1, %s3208_s18  }
  0x24   : > { %3978 = sst [smem:[#allocation26_spill]] %s3196_s15  ;;  %s3367_s21 = sand.u32 1, %s3176_s27  }
  0x25   : > { %3979 = sst [smem:[#allocation27_spill]] %s3200_s16  ;;  %s2626_s22 = smul.u32 192, %s3367_s21 }
  0x26   : > { %3980 = sst [smem:[#allocation28_spill]] %s3204_s17  ;;  %p3372_p5 = pnand %p3940_p3, %p92_p4 }
  0x27   : > { %3981 = sst [smem:[#allocation29_spill]] %s3208_s18  ;;  %s2627_s24 = smul.u32 3072, %s3200_s16 }
  0x28   : > { %s3983_s1 = sld [smem:[#allocation36_spill]]  ;;  %s457_s12 = scalar_lea.vmem [#allocation6], %s2626_s22 }
  0x29   : > { %s464_s11 = sshll.u32 %s457_s12, 4  ;;  %s3382_s10 = scalar_lea.sflag [#allocation7], %s3937_s20  ;;  %s465_s11 = int_to_ptr.vmem [resolvable:$true] %s464_s11 }
  0x2a   : > { %p3386_p6 = pneg %p3372_p5  ;;  %s2921_s6 = scalar_lea.vmem %s465_s11, 3072 }
  0x2b   : > { %p2922_p7 = scmp.ne.s32.totalorder %s465_s11, %s2921_s6  ;;  %s3210_s5 = smov [#allocation6]  }
  0x2c   : > { %s2926_s13 = sshll.u32 %s3210_s5, 4  ;;  %s2927_s13 = int_to_ptr.vmem [resolvable:$false] %s2926_s13 }
  0x2d   : > { %p2924_p8 = pnand %p2922_p7, %p3386_p6  ;;  %s2928_s15 = scalar_lea.vmem %s2927_s13, 6144 }
  0x2e   : > { %s463_s19 = scalar_lea.hbm %s3983_s1, %s2627_s24  ;;  %p2929_p10 = scmp.lt.s32.totalorder %s465_s11, %s2927_s13 }
  0x2f   : > { %p2925_p9 = pneg %p2924_p8  ;;  %p2930_p11 = scmp.lt.s32.totalorder %s2928_s15, %s2921_s6 }
  0x31   : > { %p2931_p12 = por %p2930_p11, %p2929_p10 }
  0x33   : > { %p2932_p13 = pnand %p2931_p12, %p2925_p9 }
  0x35   : > { %2935 = shalt.err (!%p2932_p13)
}
  0x36   : > { %s3211_s12 = smov 192   ;;  %s3212_s22 = smov 12  }
  0x37   : > { %2652 = dma.hbm_to_vmem [thread:$0]  (!%p3372_p5), %s463_s19, 3072, %s465_s11, %s3382_s10, %s3211_s12, %s3211_s12, %s3212_s22  }
  0x38   : > { %p2385_p1 = scmp.ge.s32.totalorder %s3208_s18, 1  ;;  %p597_p4 = scmp.lt.s32.totalorder %s3208_s18, 5 }
  0x39   : > { %s2376_s5 = sshll.u32 %s3367_s21, 6  ;;  %s2478_s24 = sshll.u32 %s3200_s16, 10 }
  0x3a   : > { %p3398_p7 = pnand %p2385_p1, %p597_p4  ;;  %s497_s13 = scalar_lea.vmem [#allocation9], %s2376_s5 }
  0x3b   : > { %s504_s15 = sshll.u32 %s497_s13, 4  ;;  %s3986_s3 = sld [smem:[#allocation38_spill]]  ;;  %s505_s15 = int_to_ptr.vmem [resolvable:$true] %s504_s15 }
  0x3c   : > { %s3987_s14 = sand.u32 1, %s3208_s18   ;;  %s2949_s7 = scalar_lea.vmem %s505_s15, 1024 }
  0x3d   : > { %s3408_s9 = scalar_lea.sflag [#allocation10], %s3987_s14  ;;  %p2950_p8 = scmp.ne.s32.totalorder %s505_s15, %s2949_s7 }
  0x3e   : > { %s3213_s11 = smov [#allocation9]  }
  0x3f   : > { %p2952_p9 = pnand %p2950_p8, %p3386_p6  ;;  %s2954_s19 = sshll.u32 %s3213_s11, 4  ;;  %s2955_s19 = int_to_ptr.vmem [resolvable:$false] %s2954_s19 }
  0x40   : > { %s2956_s12 = scalar_lea.vmem %s2955_s19, 2048  ;;  %p2957_p11 = scmp.lt.s32.totalorder %s505_s15, %s2955_s19 }
  0x41   : > { %s503_s4 = scalar_lea.hbm %s3986_s3, %s2478_s24  ;;  %p2953_p10 = pneg %p2952_p9 }
  0x42   : > { %p2958_p12 = scmp.lt.s32.totalorder %s2956_s12, %s2949_s7 }
  0x44   : > { %p2959_p13 = por %p2958_p12, %p2957_p11 }
  0x46   : > { %p2960_p1 = pnand %p2959_p13, %p2953_p10 }
  0x48   : > { %2963 = shalt.err (!%p2960_p1)
}
  0x49   : > { %s3939_s1 = smov 64   ;;  %s3942_s7 = smov 4  }
  0x4a   : > { %2658 = dma.hbm_to_vmem [thread:$0]  (!%p3372_p5), %s503_s4, 1024, %s505_s15, %s3408_s9, %s3939_s1, %s3939_s1, %s3942_s7  }
  0x4b   : > { %s3419_s14 = sadd.s32 4294967295, %s3208_s18   ;;  %s2368_s20 = sadd.s32 4294967294, %s3208_s18  }
  0x4c   : > { %s47_s22 = sadd.s32 1, %s3200_s16  ;;  %s50_s5 = sadd.s32 1, %s3204_s17 }
  0x4d   : > { %p48_p4 = scmp.ge.s32.totalorder %s47_s22, 2  ;;  %s57_s24 = sadd.s32 1, %s3188_s30 }
  0x4e   : > { %p64_p8 = scmp.ne.s32.totalorder %s3188_s30, %s3184_s29  ;;  %p3941_p9 = scmp.ne.s32.totalorder %s3184_s29, %s3180_s28 }
  0x4f   : > { %s4045_s22 = smov (%p48_p4, %s47_s22), 0  ;;  %s4047_s5 = smov (!%p48_p4, %s50_s5), %s3204_s17 }
  0x50   : > { %3988 = sst [smem:[#allocation30_spill]] %s4045_s22  ;;  %p3437_p10 = por %p65_p0, %p64_p8 }
  0x51   : > { %p71_p11 = scmp.eq.s32.totalorder %s3419_s14, 0  ;;  %p52_p12 = scmp.ge.s32.totalorder %s4047_s5, 2 }
  0x52   : > { %s80_s13 = ssub.s32 %s3200_s16, %s4045_s22  ;;  %s3992_s11 = sadd.s32 1, %s3176_s27 }
  0x53   : > { %p3447_p13 = por %p71_p11, %p3941_p9  ;;  %p81_p1 = scmp.eq.s32.totalorder %s80_s13, 0 }
  0x54   : > { %s4049_s5 = smov (%p52_p12, %s4047_s5), 0  ;;  %p3463_p0 = por %p96_p2, %p71_p11 }
  0x55   : > { %s3990_s15 = scalar_select %p3447_p13, 1, 0 }
  0x56   : > { %3991 = sst [smem:[#allocation31_spill]] %s4049_s5  ;;  %s54_s12 = ssub.s32 %s3204_s17, %s4049_s5 }
  0x57   : > { %s3456_s19 = scalar_select %p81_p1, %s3176_s27, %s3992_s11  }
  0x58   : > { %p55_p4 = scmp.eq.s32.totalorder %s54_s12, 0  ;;  %p406_p3 = scmp.eq.s32.totalorder %s3419_s14, 3 }
  0x59   : > { %3993 = sst [smem:[#allocation32_spill]] %s3456_s19  ;;  %p412_p9 = scmp.eq.s32.totalorder %s2368_s20, 3 }
  0x5a   : > { %s432_s7 = sand.u32 1, %s3188_s30   ;;  %p3475_p12 = por %p406_p3, %p64_p8 }
  0x5b   : > { %s3470_s13 = scalar_select %p55_p4, %s3188_s30, %s57_s24  }
  0x5c   : > { %s3996_s3 = scalar_select %p3475_p12, 1, 0 }
  0x5d   : > { %3995 = sst [smem:[#allocation33_spill]] %s3470_s13  ;;  %p3997_p1 = scmp.ne.s32.totalorder %s3184_s29, %s3180_s28 }
  0x5e   : > { %s2371_s25 = sshll.u32 %s432_s7, 4  ;;  %s2477_s5 = sshll.u32 %s3204_s17, 8 }
  0x5f   : > { %p3482_p13 = por %p412_p9, %p3997_p1  ;;  %s4000_s0 = sld [smem:[#allocation35_spill]] }
  0x60   : > { %s436_s20 = scalar_lea.vmem [#allocation3], %s2371_s25  ;;  %p4001_p2 = scmp.lt.s32.totalorder %s3208_s18, 4 }
  0x61   : > { %s3998_s11 = scalar_select %p3482_p13, 1, 0 }
  0x62   : > { %s443_s27 = sshll.u32 %s436_s20, 4  ;;  %p3494_p3 = pnand %p4001_p2, %p3437_p10  ;;  %s444_s27 = int_to_ptr.vmem [resolvable:$true] %s443_s27 }
  0x63   : > { %3999 = sst [smem:[#allocation34_spill]] %s3998_s11  ;;  %s2628_s13 = smul.u32 3, %s3367_s21 }
  0x64   : > { %s433_s30 = scalar_lea.sflag [#allocation4], %s432_s7  ;;  %p2966_p8 = pneg %p3494_p3 }
  0x65   : > { %s442_s12 = scalar_lea.hbm %s4000_s0, %s2477_s5  ;;  %s2977_s11 = scalar_lea.vmem %s444_s27, 256 }
  0x66   : > { %p2978_p9 = scmp.ne.s32.totalorder %s444_s27, %s2977_s11  ;;  %s3216_s22 = smov [#allocation3]  }
  0x67   : > { %s2982_s5 = sshll.u32 %s3216_s22, 4  ;;  %s2983_s5 = int_to_ptr.vmem [resolvable:$false] %s2982_s5 }
  0x68   : > { %p2980_p11 = pnand %p2978_p9, %p2966_p8  ;;  %s2984_s19 = scalar_lea.vmem %s2983_s5, 512 }
  0x69   : > { %p2985_p1 = scmp.lt.s32.totalorder %s444_s27, %s2983_s5  ;;  %p2986_p13 = scmp.lt.s32.totalorder %s2984_s19, %s2977_s11 }
  0x6a   : > { %p2981_p4 = pneg %p2980_p11 }
  0x6b   : > { %p2987_p12 = por %p2986_p13, %p2985_p1 }
  0x6d   : > { %p2988_p10 = pnand %p2987_p12, %p2981_p4 }
  0x6f   : > { %2991 = shalt.err (!%p2988_p10)
}
  0x70   : > { %s3217_s4 = smov 128   ;;  %s3218_s7 = smov 8  }
  0x71   : > { %2649 = dma.hbm_to_vmem [thread:$0]  (!%p3494_p3), %s442_s12, 256, %s444_s27, %s433_s30, %s3217_s4, %s3217_s4, %s3218_s7  }
  0x72   : > { %s2629_s25 = smul.u32 48, %s3200_s16  ;;  %s478_s20 = scalar_lea.vmem [#allocation8], %s2628_s13 }
  0x73   : > { %s486_s22 = sshll.u32 %s478_s20, 4  ;;  %s2379_s0 = sshll.u32 %s3367_s21, 7  ;;  %s487_s22 = int_to_ptr.vmem [resolvable:$true] %s486_s22 }
  0x74   : > { %s4003_s2 = sld [smem:[#allocation37_spill]]  ;;  %s3005_s17 = scalar_lea.vmem %s487_s22, 48 }
  0x75   : > { %p3006_p13 = scmp.ne.s32.totalorder %s487_s22, %s3005_s17  ;;  %s3219_s28 = smov [#allocation8]  }
  0x76   : > { %s3010_s24 = sshll.u32 %s3219_s28, 4  ;;  %s3011_s24 = int_to_ptr.vmem [resolvable:$false] %s3010_s24 }
  0x77   : > { %p3008_p12 = pnand %p3006_p13, %p3386_p6  ;;  %s3012_s18 = scalar_lea.vmem %s3011_s24, 96 }
  0x78   : > { %p3013_p8 = scmp.lt.s32.totalorder %s487_s22, %s3011_s24  ;;  %p3014_p3 = scmp.lt.s32.totalorder %s3012_s18, %s3005_s17 }
  0x79   : > { %p3009_p2 = pneg %p3008_p12 }
  0x7a   : > { %s484_s19 = scalar_lea.hbm %s4003_s2, %s2629_s25  ;;  %p3015_p9 = por %p3014_p3, %p3013_p8 }
  0x7c   : > { %p3016_p11 = pnand %p3015_p9, %p3009_p2 }
  0x7e   : > { %3019 = shalt.err (!%p3016_p11)
}
  0x7f   : > { %2655 = dma.hbm_to_vmem [thread:$0]  (!%p3372_p5), %s484_s19, 48, %s487_s22, %s3382_s10  }
  0x80   : > { %s2479_s27 = sshll.u32 %s3200_s16, 11  ;;  %s4004_s12 = sld [smem:[#allocation42_spill]] }
  0x81   : > { %s536_s28 = scalar_lea.vmem [#allocation11], %s2379_s0  ;;  %s3220_s18 = smov [#allocation11]  }
  0x82   : > { %s543_s20 = sshll.u32 %s536_s28, 4  ;;  %s3038_s5 = sshll.u32 %s3220_s18, 4  ;;  %s544_s20 = int_to_ptr.vmem [resolvable:$true] %s543_s20  ;;  %s3039_s5 = int_to_ptr.vmem [resolvable:$false] %s3038_s5 }
  0x83   : > { %s3033_s17 = scalar_lea.vmem %s544_s20, 2048  ;;  %s3040_s11 = scalar_lea.vmem %s3039_s5, 4096 }
  0x84   : > { %p3034_p4 = scmp.ne.s32.totalorder %s544_s20, %s3033_s17  ;;  %p3041_p13 = scmp.lt.s32.totalorder %s544_s20, %s3039_s5 }
  0x85   : > { %p3042_p12 = scmp.lt.s32.totalorder %s3040_s11, %s3033_s17 }
  0x86   : > { %s542_s25 = scalar_lea.hbm %s4004_s12, %s2479_s27  ;;  %p3036_p1 = pnand %p3034_p4, %p3386_p6 }
  0x87   : > { %p3043_p2 = por %p3042_p12, %p3041_p13 }
  0x88   : > { %p3037_p10 = pneg %p3036_p1 }
  0x8a   : > { %p3044_p8 = pnand %p3043_p2, %p3037_p10 }
  0x8c   : > { %3047 = shalt.err (!%p3044_p8)
}
  0x8d   : > { %2661 = dma.hbm_to_vmem [thread:$0]  (!%p3372_p5), %s542_s25, 2048, %s544_s20, %s3408_s9, %s3217_s4, %s3217_s4, %s3218_s7  }
  0x8e   : > { %s4005_s19 = sld [smem:[#allocation44_spill]]  ;;  %s564_s30 = scalar_lea.vmem [#allocation12], %s2379_s0 }
  0x8f   : > { %s571_s13 = sshll.u32 %s564_s30, 4  ;;  %s561_s12 = scalar_lea.sflag [#allocation13], %s3367_s21  ;;  %s572_s13 = int_to_ptr.vmem [resolvable:$true] %s571_s13 }
  0x90   : > { %s3061_s28 = scalar_lea.vmem %s572_s13, 2048  ;;  %s3221_s17 = smov [#allocation12]  }
  0x91   : > { %p3062_p3 = scmp.ne.s32.totalorder %s572_s13, %s3061_s28  ;;  %s3066_s18 = sshll.u32 %s3221_s17, 4  ;;  %s3067_s18 = int_to_ptr.vmem [resolvable:$false] %s3066_s18 }
  0x92   : > { %s3068_s5 = scalar_lea.vmem %s3067_s18, 4096  ;;  %p3069_p4 = scmp.lt.s32.totalorder %s572_s13, %s3067_s18 }
  0x93   : > { %p3064_p9 = pnand %p3062_p3, %p3386_p6  ;;  %p3070_p1 = scmp.lt.s32.totalorder %s3068_s5, %s3061_s28 }
  0x94   : > { %s570_s24 = scalar_lea.hbm %s4005_s19, %s2479_s27 }
  0x95   : > { %p3065_p11 = pneg %p3064_p9  ;;  %p3071_p10 = por %p3070_p1, %p3069_p4 }
  0x97   : > { %p3072_p13 = pnand %p3071_p10, %p3065_p11 }
  0x99   : > { %3075 = shalt.err (!%p3072_p13)
}
  0x9a   : > { %s4006_s0 = smov 4   ;;  %s4007_s9 = smov 64  }
  0x9b   : > { %2664 = dma.hbm_to_vmem [thread:$0]  (!%p3372_p5), %s570_s24, 2048, %s572_s13, %s561_s12, %s4007_s9, %s4007_s9, %s4006_s0  }
  0x9c   : > { %601 = sbr.rel (%p3398_p7) target bundleno = 3068 (0xbfc), region = 72  ;;  %s3546_s8 = sand.u32 (!%p3398_p7), 1, %s3184_s29  }
  0x9d   : > { %s3954_s21 = sshll.u32 (!%p3398_p7), %s3546_s8, 4  ;;  %s604_s4 = scalar_lea.sflag (!%p3398_p7), [#allocation4], %s3546_s8 }
  0x9e   : > { %s3552_s7 = scalar_lea.vmem (!%p3398_p7), [#allocation3], %s3954_s21  ;;  %p4008_p6 = scmp.ne.s32.totalorder (!%p3398_p7), %s3990_s15, 0 }
  0xa1   : > { %3147 = dma.done.wait (%p4008_p6), %s604_s4, 256  }
  0xa2   : > { %3149 = vsyncadd (%p4008_p6), %s604_s4, 4294967040  ;;  %s612_s23 = sand.u32 1, %s3419_s14   ;;  %s614_s6 = sand.u32 1, %s3172_s26  }
  0xa3   : > { %s2630_s27 = smul.u32 192, %s614_s6  ;;  %s613_s25 = scalar_lea.sflag [#allocation7], %s612_s23 }
  0xa5   : > { %s3560_s20 = scalar_lea.vmem [#allocation6], %s2630_s27 }
  0xa6   : > { %3151 = dma.done.wait (%p3463_p0), %s613_s25, 3120  }
  0xa7   : > { %3153 = vsyncadd (%p3463_p0), %s613_s25, 4294964176  ;;  %s2631_s11 = smul.u32 3, %s614_s6  ;;  %s2387_s10 = sshll.u32 %s614_s6, 6 }
  0xa8   : > { %s631_s15 = scalar_lea.sflag [#allocation10], %s612_s23  ;;  %s3568_s19 = scalar_lea.vmem [#allocation9], %s2387_s10 }
  0xa9   : > { %s3566_s22 = scalar_lea.vmem [#allocation8], %s2631_s11 }
  0xaa   : > { %3155 = dma.done.wait (%p3463_p0), %s631_s15, 3072  }
  0xab   : > { %3157 = vsyncadd (%p3463_p0), %s631_s15, 4294964224  ;;  %s2388_s14 = sshll.u32 %s614_s6, 7  ;;  %s649_s30 = scalar_lea.sflag [#allocation13], %s614_s6 }
  0xac   : > { %s3574_s24 = scalar_lea.vmem [#allocation11], %s2388_s14  ;;  %s3576_s13 = scalar_lea.vmem [#allocation12], %s2388_s14 }
  0xad   : > { %3159 = dma.done.wait (%p3463_p0), %s649_s30, 2048  }
  0xae   : > { %3161 = vsyncadd (%p3463_p0), %s649_s30, 4294965248  ;;  %s4009_s12 = sld [smem:[#allocation25_spill]]  ;;  %s4017_s6 = sshll.u32 %s3546_s8, 4 }
  0xaf   : > { %s4012_s25 = sld [smem:[#allocation41_spill]]  ;;  %s3618_s27 = scalar_lea.vmem [#allocation14], %s4017_s6 }
  0xb0   : > { %s4013_s30 = sld [smem:[#allocation43_spill]] }
  0xb1   : > { %s4014_s2 = sld [smem:[#allocation45_spill]] }
  0xb2   : > { %s4015_s0 = sld [smem:[#allocation46_spill]] }
  0xb3   : > { %s4016_s4 = sld [smem:[#allocation47_spill]] }
  0xb4   : > { %p742_p5 = scmp.lt.s32.totalorder %s4009_s12, 1  ;;  %p2392_p7 = scmp.ne.s32.totalorder %s4009_s12, 0 }
  0xb6   : > { %s3584_s28 = scalar_select %p742_p5, %s4009_s12, 1 }
  0xb7   : > { %768 = sbr.rel (%p2392_p7) target bundleno = 190 (0xbe), region = 100 }
  0xb8   : > { %s750_s11 = scalar_lea.vmem %s4012_s25, %s3584_s28  ;;  %s2391_s10 = sshll.u32 %s3584_s28, 1 }
  0xb9   : > { %s3602_s17 = scalar_lea.vmem %s4013_s30, %s2391_s10  ;;  %s757_s16 = scalar_lea.vmem %s4014_s2, %s3584_s28 }
  0xba   : > { %s760_s26 = scalar_lea.vmem %s4015_s0, %s3584_s28  ;;  %s763_s23 = scalar_lea.vmem %s4016_s4, %s3584_s28 }
  0xbc   : > { %v769_v0 = vld [vmem:[%s3552_s7] sm:$0xff]  ;;  %v770_v1 = vld [vmem:[%s3552_s7 + $0x8] sm:$0xff] }
  0xbd   : > { %771 = vst [vmem:[#allocation2] sm:$0xff] %v769_v0  ;;  %772 = vst [vmem:[#allocation2 + $0x8] sm:$0xff] %v770_v1 }
  0xbe PF: > { %v2788_v2 = vld [vmem:[%s3560_s20 + $0xac] ss:$12 sps:$4 sm:$0xff]   ;;  %v2790_v3 = vld [vmem:[%s3560_s20 + $0xa8] ss:$12 sps:$4 sm:$0xff]   ;;  %v3222_v4 = vmov 0   ;;  %v3223_v5 = vmov 0.0   ;;  %v810_v31 = vlaneseq }
  0xbf   : > { %985 = vmatprep.mubr.bf16.mxu0 %v3222_v4  ;;  %2538 = vmatprep.subr.bf16.mxu1 %v3223_v5  ;;  %v2791_v6 = vld [vmem:[%s3560_s20 + $0x94] ss:$12 sps:$4 sm:$0xff]   ;;  %v2793_v7 = vld [vmem:[%s3560_s20 + $0x90] ss:$12 sps:$4 sm:$0xff]   ;;  %v2796_v9 = vld [vmem:[%s3560_s20 + $0x78] ss:$12 sps:$4 sm:$0xff]  }
  0xc0   : > { %953 = vmatprep.subr.bf16.mxu0 %v2788_v2  ;;  %v2794_v8 = vld [vmem:[%s3560_s20 + $0x7c] ss:$12 sps:$4 sm:$0xff]   ;;  %v2797_v10 = vld [vmem:[%s3560_s20 + $0x64] ss:$12 sps:$4 sm:$0xff]   ;;  %v2799_v11 = vld [vmem:[%s3560_s20 + $0x60] ss:$12 sps:$4 sm:$0xff]  }
  0xc1   : > { %954 = vmatpush1.bf16.msra.mxu0 %v2790_v3  ;;  %v2800_v12 = vld [vmem:[%s3560_s20 + $0x4c] ss:$12 sps:$4 sm:$0xff]   ;;  %v2812_v13 = vld [vmem:[%s3560_s20 + $0xb0] ss:$12 sps:$4 sm:$0xff]   ;;  %v2802_v15 = vld [vmem:[%s3560_s20 + $0x48] ss:$12 sps:$4 sm:$0xff]  }
  0xc2   : > { %955 = vmatprep.subr.bf16.mxu0 %v2791_v6  ;;  %2539 = vmatpush3.bf16.msra.mxu1 %v2812_v13  ;;  %v2813_v14 = vld [vmem:[%s3560_s20 + $0x98] ss:$12 sps:$4 sm:$0xff]   ;;  %v2803_v16 = vld [vmem:[%s3560_s20 + $0x34] ss:$12 sps:$4 sm:$0xff]   ;;  %v2805_v17 = vld [vmem:[%s3560_s20 + $0x30] ss:$12 sps:$4 sm:$0xff]  }
  0xc3   : > { %2540 = vmatprep.subr.bf16.mxu1 %v3223_v5  ;;  %v2806_v18 = vld [vmem:[%s3560_s20 + $0x1c] ss:$12 sps:$4 sm:$0xff]   ;;  %v2814_v19 = vld [vmem:[%s3560_s20 + $0x80] ss:$12 sps:$4 sm:$0xff]   ;;  %v2808_v21 = vld [vmem:[%s3560_s20 + $0x18] ss:$12 sps:$4 sm:$0xff]  }
  0xc4   : > { %v2815_v20 = vld [vmem:[%s3560_s20 + $0x68] ss:$12 sps:$4 sm:$0xff]   ;;  %v2809_v22 = vld [vmem:[%s3560_s20 + $0x4] ss:$12 sps:$4 sm:$0xff]   ;;  %v2811_v24 = vld [vmem:[%s3560_s20] ss:$12 sps:$4 sm:$0xff]  }
  0xc5   : > { %956 = vmatpush1.bf16.msra.mxu0 %v2793_v7  ;;  %v2816_v23 = vld [vmem:[%s3560_s20 + $0x50] ss:$12 sps:$4 sm:$0xff]   ;;  %v2817_v27 = vld [vmem:[%s3560_s20 + $0x38] ss:$12 sps:$4 sm:$0xff]   ;;  %v2818_v29 = vld [vmem:[%s3560_s20 + $0x20] ss:$12 sps:$4 sm:$0xff]  }
  0xc6   : > { %957 = vmatprep.subr.bf16.mxu0 %v2794_v8  ;;  %2541 = vmatpush3.bf16.msra.mxu1 %v2813_v14  ;;  %v3649_v25 = vld [vmem:[#allocation2] sm:$0xff]  ;;  %v3651_v26 = vld [vmem:[#allocation2 + $0x8] sm:$0xff]  ;;  %vm3224_vm0 = vmmov 0   ;;  %v3670_v32 = vshrl.u32 %v810_v31, 7  ;;  %v808_v35 = vld [vmem:[%s3566_s22] sm:$0x7] }
  0xc7   : > { %2542 = vmatprep.subr.bf16.mxu1 %v3223_v5  ;;  %v775_v28 = vpack.c.bf16 %v3651_v26, %v3649_v25  ;;  %v2819_v30 = vld [vmem:[%s3560_s20 + $0x8] ss:$12 sps:$4 sm:$0xff]   ;;  %2554 = vmatprep.mubr.msk.bf16.mxu1 %vm3224_vm0, %v3223_v5  ;;  %vm1040_vm1 = vcmask 261120   ;;  %vm1088_vm2 = vcmask 130048   ;;  %s3225_s2 = smov 96   ;;  %s3226_s29 = smov 32  }
  0xc8   : > { %v816_v33 = vsub.s32 1, %v3670_v32  ;;  %v812_v40 = vsub.s32 0, %v3670_v32  ;;  %v820_v49 = vsub.s32 2, %v3670_v32  ;;  %s3227_s21 = smov 64   ;;  %vm1548_vm3 = vcmask 523264   ;;  %s4018_s22 = sld [smem:[#allocation39_spill]] }
  0xc9   : > { %958 = vmatpush1.bf16.msra.mxu0 %v2796_v9  ;;  %vm1551_vm4 = vcmask 785408   ;;  %s4020_s0 = sld [smem:[#allocation40_spill]]  ;;  %v2452_v32 = vld [vmem:[%s757_s16] ss:$0 sm:$0xff] }
  0xca   : > { %959 = vmatprep.subr.bf16.mxu0 %v2797_v10  ;;  %2543 = vmatpush3.bf16.msra.mxu1 %v2814_v19  ;;  %v817_v37 = vrot.slane %v808_v35, %v816_v33  ;;  %v813_v44 = vrot.slane %v808_v35, %v812_v40  ;;  %v821_v50 = vrot.slane %v808_v35, %v820_v49  ;;  %s4026_s4 = sld [smem:[#allocation25_spill]] }
  0xcb   : > { %2544 = vmatprep.subr.bf16.mxu1 %v3223_v5 }
  0xcd   : > { %960 = vmatpush1.bf16.msra.mxu0 %v2799_v11 }
  0xce   : > { %961 = vmatprep.subr.bf16.mxu0 %v2800_v12  ;;  %2545 = vmatpush3.bf16.msra.mxu1 %v2815_v20 }
  0xcf   : > { %2546 = vmatprep.subr.bf16.mxu1 %v3223_v5  ;;  %s4021_s25 = scalar_lea.vmem %s4020_s0, %s3584_s28 }
  0xd0   : > { %p2471_p0 = scmp.ne.s32.totalorder %s4026_s4, 1 }
  0xd1   : > { %962 = vmatpush1.bf16.msra.mxu0 %v2802_v15 }
  0xd2   : > { %963 = vmatprep.subr.bf16.mxu0 %v2803_v16  ;;  %2547 = vmatpush3.bf16.msra.mxu1 %v2816_v23 }
  0xd3   : > { %2548 = vmatprep.subr.bf16.mxu1 %v3223_v5 }
  0xd5   : > { %964 = vmatpush1.bf16.msra.mxu0 %v2805_v17 }
  0xd6   : > { %965 = vmatprep.subr.bf16.mxu0 %v2806_v18  ;;  %2549 = vmatpush3.bf16.msra.mxu1 %v2817_v27 }
  0xd7   : > { %2550 = vmatprep.subr.bf16.mxu1 %v3223_v5 }
  0xd9   : > { %966 = vmatpush1.bf16.msra.mxu0 %v2808_v21 }
  0xda   : > { %967 = vmatprep.subr.bf16.mxu0 %v2809_v22  ;;  %2551 = vmatpush3.bf16.msra.mxu1 %v2818_v29 }
  0xdb   : > { %2552 = vmatprep.subr.bf16.mxu1 %v3223_v5 }
  0xdd   : > { %968 = vmatpush1.bf16.msra.mxu0 %v2811_v24 }
  0xde   : > { %2582 = vmatprep.subr.bf16.mxu0 %v3223_v5  ;;  %2553 = vmatpush3.bf16.msra.mxu1 %v2819_v30 }
  0xdf   : > { %2558 = vmatprep.subr.bf16.mxu1 %v3223_v5 }
  0xe0   : > { %986 = vmatmul.mubr.bf16.vlgmr.msra.gmra.mxu0 %v775_v28 }
  0xe1   : > { %2584 = vmatprep.mubr.msk.bf16.mxu0 %vm3224_vm0, %v3223_v5  ;;  %2555 = vmatmul.mubr.bf16.vlgmr.msra.gmra.mxu1 %v775_v28 }
  0xe2   : > { %2560 = vmatprep.mubr.msk.bf16.mxu1 %vm3224_vm0, %v3223_v5 }
 0x1a0   : > { %v987_v34 = vpop.f32.mrf.mxu0 }
 0x1a1   : > { %v988_v47 = vadd.f32 %v987_v34, %v813_v44  ;;  %v1030_v51 = vpop.f32.mrf.mxu1 }
 0x1a2   : > { %v989_v36 = vpop.f32.mrf.mxu0  ;;  %v1031_v53 = vadd.f32 %v1030_v51, %v821_v50 }
 0x1a3   : > { %v990_v41 = vadd.f32 %v989_v36, %v817_v37  ;;  %v2556_v52 = vpop.f32.mrf.mxu1 }
 0x1a4   : > { %v991_v38 = vpop.f32.mrf.mxu0 }
 0x1a5   : > { %v992_v46 = vadd.f32 %v991_v38, %v813_v44  ;;  %v1033_v54 = vpop.f32.mrf.mxu1 }
 0x1a6   : > { %v993_v39 = vpop.f32.mrf.mxu0  ;;  %v1034_v55 = vadd.f32 %v1033_v54, %v821_v50 }
 0x1a7   : > { %v994_v42 = vadd.f32 %v993_v39, %v817_v37  ;;  %v1037_v48 = vpack.c.bf16 %v992_v46, %v988_v47  ;;  %v2557_v56 = vpop.f32.mrf.mxu1 }
 0x1a8   : > { %v3685_v57 = vpack.c.bf16 %v1034_v55, %v1031_v53 }
 0x1a9   : > { %v1038_v43 = vpack.c.bf16 %v994_v42, %v990_v41 }
 0x1ab   : > { %v1045_v45 = vsel %vm1040_vm1, %v1038_v43, 0 }
 0x1ac   : > { %2559 = vmatpush3.bf16.xpose.msra.mxu1 %v1045_v45 }
 0x1ad   : > { %2564 = vmatprep.subr.bf16.mxu1 %v3223_v5 }
 0x1b3   : > { %2561 = vmatmul.mubr.msk.bf16.vlgmr.msra.gmra.mxu1 %vm1040_vm1, %v1037_v48 }
 0x1b4   : > { %2566 = vmatprep.mubr.msk.bf16.mxu1 %vm3224_vm0, %v3223_v5  ;;  %2565 = vmatpush3.bf16.msra.mxu1 %v3685_v57 }
 0x1b5   : > { %2570 = vmatprep.subr.bf16.mxu1 %v3223_v5 }
 0x273   : > { %v1081_v58 = vpop.f32.mrf.mxu1 }
 0x274   : > { %v1089_v59 = vsel %vm1088_vm2, %v1081_v58, -inf }
 0x275   : > { %1090 = vmax.xlane.f32.xlu0 %v1089_v59  ;;  %v2562_v60 = vpop.f32.mrf.mxu1 }
 0x277   : > { %v1084_v61 = vpop.f32.mrf.mxu1 }
 0x278   : > { %v1092_v62 = vsel %vm1088_vm2, %v1084_v61, -inf }
 0x279   : > { %1093 = vmax.xlane.f32.xlu0 %v1092_v62  ;;  %v2563_v63 = vpop.f32.mrf.mxu1 }
 0x28f   : > { %1160 = vrot.lane.b32.xlu0 %v1038_v43, %s3225_s2 }
 0x293   : > { %1403 = vrot.lane.b32.xlu0 %v1038_v43, %s3226_s29 }
 0x2fe   : > { %v1091_v0 = vpop.xlane.xlu0 %1090 }
 0x2ff   : > { %v1095_v1 = vsub.f32 %v1081_v58, %v1091_v0 }
 0x301   : > { %v1097_v2 = vmul.f32 1.442695, %v1095_v1 }
 0x302   : > { %v1094_v3 = vpop.xlane.xlu0 %1093 }
 0x303   : > { %2868 = vpow2.f32 %v1097_v2  ;;  %v1096_v6 = vsub.f32 %v1084_v61, %v1094_v3 }
 0x305   : > { %v1099_v7 = vmul.f32 1.442695, %v1096_v6 }
 0x306   : > { %v1161_v15 = vpop.permute.xlu0 %1160 }
 0x307   : > { %2870 = vpow2.f32 %v1099_v7  ;;  %v1166_v28 = vsel %vm1040_vm1, %v1161_v15, 0 }
 0x30a   : > { %v1404_v20 = vpop.permute.xlu0 %1403 }
 0x30b   : > { %v1409_v24 = vsel %vm1040_vm1, %v1404_v20, 0 }
 0x310   : > { %v2869_v8 = vpop.eup %2868 }
 0x311   : > { %v1101_v9 = vsel %vm1088_vm2, %v2869_v8, 0.0 }
 0x312   : > { %1102 = vadd.xlane.f32.xlu1 %v1101_v9 }
 0x314   : > { %v2871_v10 = vpop.eup %2870 }
 0x315   : > { %v1104_v11 = vsel %vm1088_vm2, %v2871_v10, 0.0 }
 0x316   : > { %1105 = vadd.xlane.f32.xlu1 %v1104_v11 }
 0x327   : > { %1157 = vrot.lane.b32.xlu1 %v1037_v48, %s3225_s2 }
 0x32b   : > { %1282 = vrot.lane.b32.xlu1 %v1038_v43, %s3227_s21 }
 0x32f   : > { %1280 = vrot.lane.b32.xlu1 %v1037_v48, %s3227_s21 }
 0x333   : > { %1401 = vrot.lane.b32.xlu1 %v1037_v48, %s3226_s29 }
 0x39b   : > { %v1103_v12 = vpop.xlane.xlu1 %1102 }
 0x39c   : > { %2872 = vrcp.f32 %v1103_v12 }
 0x39f   : > { %v1106_v13 = vpop.xlane.xlu1 %1105 }
 0x3a0   : > { %2874 = vrcp.f32 %v1106_v13 }
 0x3a3   : > { %v1158_v14 = vpop.permute.xlu1 %1157 }
 0x3a7   : > { %v1283_v16 = vpop.permute.xlu1 %1282 }
 0x3a8   : > { %v1288_v17 = vsel %vm1040_vm1, %v1283_v16, 0 }
 0x3a9   : > { %2583 = vmatpush3.bf16.xpose.msra.mxu0 %v1288_v17  ;;  %v2873_v18 = vpop.eup %2872 }
 0x3aa   : > { %2594 = vmatprep.subr.bf16.mxu0 %v3223_v5  ;;  %v1109_v21 = vmul.f32 %v2873_v18, %v2869_v8 }
 0x3ab   : > { %v1281_v23 = vpop.permute.xlu1 %1280 }
 0x3ad   : > { %v2875_v19 = vpop.eup %2874 }
 0x3ae   : > { %v1110_v22 = vmul.f32 %v2875_v19, %v2871_v10 }
 0x3af   : > { %v1402_v29 = vpop.permute.xlu1 %1401 }
 0x3b0   : > { %2585 = vmatmul.mubr.msk.bf16.vlgmr.msra.gmra.mxu0 %vm1040_vm1, %v1281_v23  ;;  %v1111_v27 = vpack.c.bf16 %v1110_v22, %v1109_v21 }
 0x3b1   : > { %2595 = vmatpush3.bf16.xpose.msra.mxu0 %v1409_v24  ;;  %2596 = vmatprep.mubr.msk.bf16.mxu0 %vm3224_vm0, %v3223_v5 }
 0x3b2   : > { %2567 = vmatmul.mubr.msk.bf16.vlgmr.msra.gmra.mxu1 %vm1088_vm2, %v1111_v27  ;;  %2606 = vmatprep.subr.bf16.mxu0 %v3223_v5 }
 0x3b3   : > { %2571 = vmatpush3.bf16.xpose.msra.mxu1 %v1166_v28  ;;  %2572 = vmatprep.mubr.msk.bf16.mxu1 %vm3224_vm0, %v3223_v5 }
 0x3b4   : > { %2576 = vmatprep.subr.bf16.mxu1 %v3223_v5 }
 0x3b8   : > { %2597 = vmatmul.mubr.msk.bf16.vlgmr.msra.gmra.mxu0 %vm1040_vm1, %v1402_v29 }
 0x3b9   : > { %2622 = vmatprep.mubr.msk.bf16.mxu0 %vm3224_vm0, %v3223_v5 }
 0x3ba   : > { %2573 = vmatmul.mubr.msk.bf16.vlgmr.msra.gmra.mxu1 %vm1040_vm1, %v1158_v14 }
 0x3bb   : > { %2578 = vmatprep.mubr.msk.bf16.mxu1 %vm3224_vm0, %v3223_v5 }
 0x470   : > { %v1324_v30 = vpop.f32.mrf.mxu0 }
 0x471   : > { %v1331_v49 = vsel %vm1088_vm2, %v1324_v30, -inf }
 0x472   : > { %v3717_v31 = vpop.f32.mrf.mxu1  ;;  %v2586_v34 = vpop.f32.mrf.mxu0 }
 0x474   : > { %v2568_v35 = vpop.f32.mrf.mxu1  ;;  %v1327_v36 = vpop.f32.mrf.mxu0 }
 0x475   : > { %v1334_v52 = vsel %vm1088_vm2, %v1327_v36, -inf }
 0x476   : > { %v3719_v37 = vpop.f32.mrf.mxu1  ;;  %v2587_v38 = vpop.f32.mrf.mxu0 }
 0x478   : > { %v2569_v39 = vpop.f32.mrf.mxu1  ;;  %v1445_v41 = vpop.f32.mrf.mxu0 }
 0x479   : > { %v1452_v54 = vsel %vm1088_vm2, %v1445_v41, -inf }
 0x47a   : > { %v1202_v42 = vpop.f32.mrf.mxu1  ;;  %v2598_v43 = vpop.f32.mrf.mxu0 }
 0x47b   : > { %v1209_v44 = vsel %vm1088_vm2, %v1202_v42, -inf }
 0x47c   : > { %v1448_v45 = vpop.f32.mrf.mxu0  ;;  %1210 = vmax.xlane.f32.xlu0 %v1209_v44  ;;  %v2574_v46 = vpop.f32.mrf.mxu1 }
 0x47d   : > { %v1455_v53 = vsel %vm1088_vm2, %v1448_v45, -inf }
 0x47e   : > { %v1205_v47 = vpop.f32.mrf.mxu1  ;;  %v2599_v48 = vpop.f32.mrf.mxu0 }
 0x47f   : > { %v1212_v50 = vsel %vm1088_vm2, %v1205_v47, -inf }
 0x480   : > { %1332 = vmax.xlane.f32.xlu0 %v1331_v49  ;;  %1213 = vmax.xlane.f32.xlu1 %v1212_v50  ;;  %v2575_v51 = vpop.f32.mrf.mxu1 }
 0x484   : > { %1335 = vmax.xlane.f32.xlu0 %v1334_v52  ;;  %1456 = vmax.xlane.f32.xlu1 %v1455_v53 }
 0x488   : > { %1453 = vmax.xlane.f32.xlu0 %v1452_v54  ;;  %v2820_v54 = vld [vmem:[%s3568_s19 + $0x38] sm:$0xff]  }
 0x489   : > { %2607 = vmatpush3.bf16.msra.mxu0 %v2820_v54  ;;  %v2834_v54 = vld [vmem:[%s3574_s24 + $0x50] ss:$8 sps:$4 sm:$0xff]  }
 0x48a   : > { %2608 = vmatprep.subr.bf16.mxu0 %v3223_v5 }
 0x505   : > { %v1211_v55 = vpop.xlane.xlu0 %1210 }
 0x506   : > { %v1215_v1 = vsub.f32 %v1202_v42, %v1211_v55  ;;  %v2821_v55 = vld [vmem:[%s3568_s19 + $0x30] sm:$0xff]  }
 0x507   : > { %2609 = vmatpush3.bf16.msra.mxu0 %v2821_v55  ;;  %v2837_v55 = vld [vmem:[%s3574_s24 + $0x40] ss:$8 sps:$4 sm:$0xff]  }
 0x508   : > { %v1217_v9 = vmul.f32 1.442695, %v1215_v1  ;;  %2610 = vmatprep.subr.bf16.mxu0 %v3223_v5 }
 0x509   : > { %v1333_v56 = vpop.xlane.xlu0 %1332  ;;  %v1214_v58 = vpop.xlane.xlu1 %1213 }
 0x50a   : > { %v1337_v59 = vsub.f32 %v1324_v30, %v1333_v56  ;;  %v1216_v2 = vsub.f32 %v1205_v47, %v1214_v58  ;;  %v2822_v56 = vld [vmem:[%s3568_s19 + $0x28] sm:$0xff]   ;;  %v2823_v58 = vld [vmem:[%s3568_s19 + $0x20] sm:$0xff]  }
 0x50b   : > { %2611 = vmatpush3.bf16.msra.mxu0 %v2822_v56  ;;  %v2839_v56 = vld [vmem:[%s3574_s24 + $0x44] ss:$8 sps:$4 sm:$0xff]  }
 0x50c   : > { %v1339_v60 = vmul.f32 1.442695, %v1337_v59  ;;  %v1219_v10 = vmul.f32 1.442695, %v1216_v2  ;;  %2612 = vmatprep.subr.bf16.mxu0 %v3223_v5  ;;  %v2824_v59 = vld [vmem:[%s3568_s19 + $0x18] sm:$0xff]  }
 0x50d   : > { %v1336_v61 = vpop.xlane.xlu0 %1335  ;;  %v1457_v62 = vpop.xlane.xlu1 %1456 }
 0x50e   : > { %2876 = vpow2.f32 %v1339_v60  ;;  %v1338_v63 = vsub.f32 %v1327_v36, %v1336_v61  ;;  %v1459_v0 = vsub.f32 %v1448_v45, %v1457_v62  ;;  %v2825_v61 = vld [vmem:[%s3568_s19 + $0x10] sm:$0xff]  }
 0x50f   : > { %2613 = vmatpush3.bf16.msra.mxu0 %v2823_v58  ;;  %v2842_v58 = vld [vmem:[%s3574_s24 + $0x34] ss:$8 sps:$4 sm:$0xff]  }
 0x510   : > { %v1341_v3 = vmul.f32 1.442695, %v1338_v63  ;;  %v1462_v6 = vmul.f32 1.442695, %v1459_v0  ;;  %2614 = vmatprep.subr.bf16.mxu0 %v3223_v5  ;;  %v2826_v0 = vld [vmem:[%s3568_s19 + $0x8] sm:$0xff]  }
 0x511   : > { %v1454_v7 = vpop.xlane.xlu0 %1453 }
 0x512   : > { %2878 = vpow2.f32 %v1341_v3  ;;  %v1458_v8 = vsub.f32 %v1445_v41, %v1454_v7 }
 0x513   : > { %2880 = vpow2.f32 %v1462_v6  ;;  %2615 = vmatpush3.bf16.msra.mxu0 %v2824_v59  ;;  %v2827_v6 = vld [vmem:[%s3568_s19] sm:$0xff]   ;;  %s4019_s19 = scalar_lea.vmem %s4018_s22, %s3584_s28  ;;  %v2840_v59 = vld [vmem:[%s3574_s24 + $0x30] ss:$8 sps:$4 sm:$0xff]  }
 0x514   : > { %v1460_v11 = vmul.f32 1.442695, %v1458_v8  ;;  %2616 = vmatprep.subr.bf16.mxu0 %v3223_v5 }
 0x516   : > { %2882 = vpow2.f32 %v1460_v11 }
 0x517   : > { %2884 = vpow2.f32 %v1217_v9  ;;  %2617 = vmatpush3.bf16.msra.mxu0 %v2825_v61  ;;  %v2848_v61 = vld [vmem:[%s3574_s24 + $0x14] ss:$8 sps:$4 sm:$0xff]  }
 0x518   : > { %2886 = vpow2.f32 %v1219_v10  ;;  %2618 = vmatprep.subr.bf16.mxu0 %v3223_v5 }
 0x51b   : > { %v2877_v12 = vpop.eup %2876  ;;  %2619 = vmatpush3.bf16.msra.mxu0 %v2826_v0  ;;  %v2849_v0 = vld [vmem:[%s3574_s24] ss:$8 sps:$4 sm:$0xff]  }
 0x51c   : > { %v1343_v13 = vsel %vm1088_vm2, %v2877_v12, 0.0  ;;  %2620 = vmatprep.subr.bf16.mxu0 %v3223_v5 }
 0x51d   : > { %1344 = vadd.xlane.f32.xlu0 %v1343_v13 }
 0x51f   : > { %v2879_v14 = vpop.eup %2878  ;;  %2621 = vmatpush3.bf16.msra.mxu0 %v2827_v6  ;;  %v2855_v6 = vld [vmem:[%s3576_s13 + $0x30] sm:$0xff]  }
 0x520   : > { %v1346_v15 = vsel %vm1088_vm2, %v2879_v14, 0.0  ;;  %v2881_v16 = vpop.eup %2880 }
 0x521   : > { %1347 = vadd.xlane.f32.xlu1 %v1346_v15  ;;  %v1467_v20 = vsel %vm1088_vm2, %v2881_v16, 0.0 }
 0x523   : > { %v2883_v17 = vpop.eup %2882 }
 0x524   : > { %v2885_v18 = vpop.eup %2884  ;;  %v1464_v19 = vsel %vm1088_vm2, %v2883_v17, 0.0 }
 0x525   : > { %v2887_v21 = vpop.eup %2886  ;;  %1465 = vadd.xlane.f32.xlu0 %v1464_v19  ;;  %1468 = vadd.xlane.f32.xlu1 %v1467_v20  ;;  %v1221_v22 = vsel %vm1088_vm2, %v2885_v18, 0.0 }
 0x526   : > { %v1224_v23 = vsel %vm1088_vm2, %v2887_v21, 0.0 }
 0x529   : > { %1222 = vadd.xlane.f32.xlu0 %v1221_v22  ;;  %1225 = vadd.xlane.f32.xlu1 %v1224_v23 }
 0x53a   : > { %1354 = vrot.lane.b32.xlu1 %v3685_v57, %s3227_s21 }
 0x53e   : > { %1475 = vrot.lane.b32.xlu1 %v3685_v57, %s3226_s29 }
 0x53f   : > { %1233 = vrot.lane.b32.xlu0 %v3685_v57, %s3225_s2 }
 0x5a6   : > { %v1345_v24 = vpop.xlane.xlu0 %1344 }
 0x5aa   : > { %v1348_v27 = vpop.xlane.xlu1 %1347 }
 0x5ae   : > { %v1466_v28 = vpop.xlane.xlu0 %1465  ;;  %v1469_v29 = vpop.xlane.xlu1 %1468 }
 0x5b2   : > { %v1223_v30 = vpop.xlane.xlu0 %1222  ;;  %v1226_v34 = vpop.xlane.xlu1 %1225 }
 0x5b3   : > { %2888 = vrcp.f32 %v1223_v30 }
 0x5b4   : > { %2890 = vrcp.f32 %v1226_v34 }
 0x5b5   : > { %2892 = vrcp.f32 %v1348_v27 }
 0x5b6   : > { %v1234_v35 = vpop.permute.xlu0 %1233  ;;  %2894 = vrcp.f32 %v1345_v24  ;;  %v1355_v43 = vpop.permute.xlu1 %1354 }
 0x5b7   : > { %2577 = vmatpush3.bf16.msra.mxu1 %v1234_v35  ;;  %2896 = vrcp.f32 %v1466_v28  ;;  %v2425_v35 = vld [vmem:[%s4019_s19] ss:$0 sm:$0xff] }
 0x5b8   : > { %2588 = vmatprep.subr.bf16.mxu1 %v3223_v5  ;;  %2898 = vrcp.f32 %v1469_v29 }
 0x5ba   : > { %v1476_v50 = vpop.permute.xlu1 %1475 }
 0x5c0   : > { %v2889_v36 = vpop.eup %2888 }
 0x5c1   : > { %v2891_v38 = vpop.eup %2890  ;;  %v1229_v39 = vmul.f32 %v2889_v36, %v2885_v18 }
 0x5c2   : > { %v1230_v57 = vmul.f32 %v2891_v38, %v2887_v21  ;;  %v2893_v42 = vpop.eup %2892 }
 0x5c3   : > { %v2895_v44 = vpop.eup %2894  ;;  %v1352_v45 = vmul.f32 %v2893_v42, %v2879_v14 }
 0x5c4   : > { %v1231_v41 = vpack.c.bf16 %v1230_v57, %v1229_v39  ;;  %v1351_v46 = vmul.f32 %v2895_v44, %v2877_v12  ;;  %v2897_v47 = vpop.eup %2896  ;;  %v2830_v44 = vld [vmem:[%s3574_s24 + $0x74] ss:$8 sps:$4 sm:$0xff]  }
 0x5c5   : > { %v2899_v49 = vpop.eup %2898  ;;  %v1472_v51 = vmul.f32 %v2897_v47, %v2883_v17 }
 0x5c6   : > { %2579 = vmatmul.mubr.msk.bf16.vlgmr.msra.gmra.mxu1 %vm1088_vm2, %v1231_v41  ;;  %v1353_v48 = vpack.c.bf16 %v1352_v45, %v1351_v46  ;;  %v1473_v52 = vmul.f32 %v2899_v49, %v2881_v16 }
 0x5c7   : > { %2589 = vmatpush3.bf16.msra.mxu1 %v1355_v43  ;;  %2590 = vmatprep.mubr.msk.bf16.mxu1 %vm3224_vm0, %v3223_v5  ;;  %v2828_v43 = vld [vmem:[%s3574_s24 + $0x70] ss:$8 sps:$4 sm:$0xff]  }
 0x5c8   : > { %2600 = vmatprep.subr.bf16.mxu1 %v3223_v5  ;;  %v1474_v53 = vpack.c.bf16 %v1473_v52, %v1472_v51  ;;  %v2833_v51 = vld [vmem:[%s3574_s24 + $0x64] ss:$8 sps:$4 sm:$0xff]   ;;  %v2831_v52 = vld [vmem:[%s3574_s24 + $0x60] ss:$8 sps:$4 sm:$0xff]  }
 0x5ce   : > { %2591 = vmatmul.mubr.msk.bf16.vlgmr.msra.gmra.mxu1 %vm1088_vm2, %v1353_v48 }
 0x5cf   : > { %2601 = vmatpush3.bf16.msra.mxu1 %v1476_v50  ;;  %2602 = vmatprep.mubr.msk.bf16.mxu1 %vm3224_vm0, %v3223_v5 }
 0x5d0   : > { %1819 = vmatprep.subr.bf16.mxu1 %v2830_v44 }
 0x5d6   : > { %2603 = vmatmul.mubr.msk.bf16.vlgmr.msra.gmra.mxu1 %vm1088_vm2, %v1474_v53  ;;  %v2836_v53 = vld [vmem:[%s3574_s24 + $0x54] ss:$8 sps:$4 sm:$0xff]  }
 0x5d7   : > { %1851 = vmatprep.mubr.bf16.mxu1 %v3222_v4  ;;  %1820 = vmatpush1.bf16.msra.mxu1 %v2828_v43 }
 0x5d8   : > { %1821 = vmatprep.subr.bf16.mxu1 %v2833_v51 }
 0x5db   : > { %1822 = vmatpush1.bf16.msra.mxu1 %v2831_v52 }
 0x5dc   : > { %1823 = vmatprep.subr.bf16.mxu1 %v2836_v53 }
 0x5df   : > { %1824 = vmatpush1.bf16.msra.mxu1 %v2834_v54 }
 0x5e0   : > { %1825 = vmatprep.subr.bf16.mxu1 %v2839_v56 }
 0x5e3   : > { %1826 = vmatpush1.bf16.msra.mxu1 %v2837_v55 }
 0x5e4   : > { %1827 = vmatprep.subr.bf16.mxu1 %v2842_v58 }
 0x5e7   : > { %1828 = vmatpush1.bf16.msra.mxu1 %v2840_v59 }
 0x686   : > { %v1273_v4 = vpop.f32.mrf.mxu1 }
 0x688   : > { %v2580_v60 = vpop.f32.mrf.mxu1 }
 0x689   : > { %v2843_v60 = vld [vmem:[%s3574_s24 + $0x20] ss:$8 sps:$4 sm:$0xff]  }
 0x68a   : > { %v1276_v62 = vpop.f32.mrf.mxu1 }
 0x68b   : > { %v2773_v63 = vpack.i.bf16 %v1276_v62, %v1273_v4  ;;  %v2845_v4 = vld [vmem:[%s3574_s24 + $0x24] ss:$8 sps:$4 sm:$0xff]   ;;  %v2846_v62 = vld [vmem:[%s3574_s24 + $0x10] ss:$8 sps:$4 sm:$0xff]  }
 0x68c   : > { %v2581_v1 = vpop.f32.mrf.mxu1  ;;  %1829 = vmatprep.subr.bf16.mxu1 %v2845_v4 }
 0x68d   : > { %2774 = vrot.lane.b32.xlu1 %v2773_v63, %s3226_s29  ;;  %1830 = vmatpush1.bf16.msra.mxu1 %v2843_v60  ;;  %v2851_v63 = vld [vmem:[%s3574_s24 + $0x4] ss:$8 sps:$4 sm:$0xff]   ;;  %v2852_v1 = vld [vmem:[%s3576_s13 + $0x78] sm:$0xff]  }
 0x68e   : > { %v1394_v2 = vpop.f32.mrf.mxu1  ;;  %1831 = vmatprep.subr.bf16.mxu1 %v2848_v61  ;;  %2516 = vmatprep.subr.bf16.mxu0 %v2852_v1 }
 0x690   : > { %v2592_v3 = vpop.f32.mrf.mxu1 }
 0x691   : > { %1832 = vmatpush1.bf16.msra.mxu1 %v2846_v62  ;;  %v2854_v3 = vld [vmem:[%s3576_s13 + $0x70] sm:$0xff]  }
 0x692   : > { %v1397_v7 = vpop.f32.mrf.mxu1  ;;  %1833 = vmatprep.subr.bf16.mxu1 %v2851_v63 }
 0x693   : > { %v2778_v8 = vpack.i.bf16 %v1397_v7, %v1394_v2  ;;  %v2853_v2 = vld [vmem:[%s3576_s13 + $0x38] sm:$0xff]   ;;  %v2856_v7 = vld [vmem:[%s3576_s13 + $0x68] sm:$0xff]  }
 0x694   : > { %v2593_v9 = vpop.f32.mrf.mxu1 }
 0x695   : > { %2779 = vrot.lane.b32.xlu0 %v2778_v8, %s3227_s21  ;;  %1834 = vmatpush1.bf16.msra.mxu1 %v2849_v0  ;;  %v2857_v8 = vld [vmem:[%s3576_s13 + $0x28] sm:$0xff]   ;;  %v2858_v9 = vld [vmem:[%s3576_s13 + $0x60] sm:$0xff]  }
 0x696   : > { %v1515_v10 = vpop.f32.mrf.mxu1 }
 0x698   : > { %v2604_v11 = vpop.f32.mrf.mxu1 }
 0x699   : > { %v2860_v11 = vld [vmem:[%s3576_s13 + $0x58] sm:$0xff]  }
 0x69a   : > { %v1518_v12 = vpop.f32.mrf.mxu1 }
 0x69b   : > { %v2783_v13 = vpack.i.bf16 %v1518_v12, %v1515_v10  ;;  %v2859_v10 = vld [vmem:[%s3576_s13 + $0x20] sm:$0xff]   ;;  %v2861_v12 = vld [vmem:[%s3576_s13 + $0x18] sm:$0xff]  }
 0x69c   : > { %v2605_v14 = vpop.f32.mrf.mxu1 }
 0x69d   : > { %2784 = vrot.lane.b32.xlu1 %v2783_v13, %s3225_s2 }
 0x6ff   : > { %v2775_v15 = vpop.permute.xlu1 %2774 }
 0x700   : > { %v2777_v17 = vunpack.i.h.bf16 %v2775_v15  ;;  %v2776_v18 = vunpack.i.l.bf16 %v2775_v15 }
 0x702   : > { %v1547_v21 = vsel %vm1040_vm1, %v3719_v37, %v2777_v17  ;;  %v1546_v22 = vsel %vm1040_vm1, %v3717_v31, %v2776_v18 }
 0x707   : > { %v2780_v16 = vpop.permute.xlu0 %2779 }
 0x708   : > { %v2782_v5 = vunpack.i.h.bf16 %v2780_v16  ;;  %v2781_v19 = vunpack.i.l.bf16 %v2780_v16 }
 0x70a   : > { %v1550_v27 = vsel %vm1548_vm3, %v1547_v21, %v2782_v5  ;;  %v1549_v28 = vsel %vm1548_vm3, %v1546_v22, %v2781_v19 }
 0x70f   : > { %v2785_v20 = vpop.permute.xlu1 %2784 }
 0x710   : > { %v2787_v23 = vunpack.i.h.bf16 %v2785_v20  ;;  %v2786_v24 = vunpack.i.l.bf16 %v2785_v20  ;;  %v2434_v20 = vld [vmem:[%s4021_s25] ss:$0 sm:$0xff] }
 0x712   : > { %v1553_v29 = vsel %vm1551_vm4, %v1550_v27, %v2787_v23  ;;  %v1552_v30 = vsel %vm1551_vm4, %v1549_v28, %v2786_v24  ;;  %v2435_v24 = vld [vmem:[%s750_s11] ss:$0 sm:$0xff] }
 0x713   : > { %v1554_v34 = vpack.c.bf16 %v1553_v29, %v1552_v30 }
 0x715   : > { %2623 = vmatmul.mubr.bf16.vlgmr.msra.gmra.mxu0 %v1554_v34  ;;  %v2862_v34 = vld [vmem:[%s3576_s13 + $0x50] sm:$0xff]  }
 0x716   : > { %2517 = vmatpush3.bf16.msra.mxu0 %v2853_v2 }
 0x717   : > { %2518 = vmatprep.subr.bf16.mxu0 %v2854_v3 }
 0x71a   : > { %2519 = vmatpush3.bf16.msra.mxu0 %v2855_v6 }
 0x71b   : > { %2520 = vmatprep.subr.bf16.mxu0 %v2856_v7 }
 0x71e   : > { %2521 = vmatpush3.bf16.msra.mxu0 %v2857_v8 }
 0x71f   : > { %2522 = vmatprep.subr.bf16.mxu0 %v2858_v9 }
 0x722   : > { %2523 = vmatpush3.bf16.msra.mxu0 %v2859_v10 }
 0x723   : > { %2524 = vmatprep.subr.bf16.mxu0 %v2860_v11 }
 0x726   : > { %2525 = vmatpush3.bf16.msra.mxu0 %v2861_v12 }
 0x727   : > { %2526 = vmatprep.subr.bf16.mxu0 %v2862_v34 }
 0x7d5   : > { %v1660_v36 = vpop.f32.mrf.mxu0 }
 0x7d6   : > { %v1661_v37 = vadd.f32 %v2425_v35, %v1660_v36  ;;  %v2864_v36 = vld [vmem:[%s3576_s13 + $0x48] sm:$0xff]  }
 0x7d7   : > { %v2624_v38 = vpop.f32.mrf.mxu0 }
 0x7d8   : > { %v1667_v31 = vadd.f32 %v1661_v37, %v3649_v25  ;;  %v2865_v37 = vld [vmem:[%s3576_s13 + $0x8] sm:$0xff]   ;;  %v2866_v38 = vld [vmem:[%s3576_s13 + $0x40] sm:$0xff]  }
 0x7d9   : > { %v1663_v39 = vpop.f32.mrf.mxu0 }
 0x7da   : > { %v1664_v57 = vadd.f32 %v2425_v35, %v1663_v39  ;;  %1669 = vadd.xlane.f32.xlu0 %v1667_v31  ;;  %v2863_v35 = vld [vmem:[%s3576_s13 + $0x10] sm:$0xff]   ;;  %v1727_v39 = vld [vmem:[%s3602_s17] sm:$0x3] }
 0x7db   : > { %v2625_v41 = vpop.f32.mrf.mxu0  ;;  %2527 = vmatpush3.bf16.msra.mxu0 %v2863_v35 }
 0x7dc   : > { %v1668_v42 = vadd.f32 %v1664_v57, %v3651_v26  ;;  %2528 = vmatprep.subr.bf16.mxu0 %v2864_v36  ;;  %v1736_v41 = vrot.slane %v1727_v39, %v816_v33 }
 0x7de   : > { %1671 = vadd.xlane.f32.xlu1 %v1668_v42 }
 0x7df   : > { %2529 = vmatpush3.bf16.msra.mxu0 %v2865_v37 }
 0x7e0   : > { %2530 = vmatprep.subr.bf16.mxu0 %v2866_v38 }
 0x863   : > { %v1670_v45 = vpop.xlane.xlu0 %1669 }
 0x864   : > { %v1674_v46 = vmul.f32 0.0078125, %v1670_v45 }
 0x866   : > { %v3780_v47 = vsub.f32 %v1667_v31, %v1674_v46  ;;  %v2867_v31 = vld [vmem:[%s3576_s13] sm:$0xff]  }
 0x867   : > { %v1672_v25 = vpop.xlane.xlu1 %1671  ;;  %2531 = vmatpush3.bf16.msra.mxu0 %v2867_v31 }
 0x868   : > { %v1675_v48 = vmul.f32 0.0078125, %v1672_v25  ;;  %v1678_v26 = vmul.f32 %v3780_v47, %v3780_v47 }
 0x86a   : > { %v3784_v49 = vsub.f32 %v1668_v42, %v1675_v48  ;;  %1680 = vadd.xlane.f32.xlu0 %v1678_v26  ;;  %v1732_v42 = vrot.slane %v1727_v39, %v812_v40 }
 0x86c   : > { %v1679_v50 = vmul.f32 %v3784_v49, %v3784_v49 }
 0x86e   : > { %1682 = vadd.xlane.f32.xlu0 %v1679_v50 }
 0x8f3   : > { %v1681_v13 = vpop.xlane.xlu0 %1680 }
 0x8f4   : > { %v1684_v14 = vmul.f32 0.0078125, %v1681_v13 }
 0x8f6   : > { %v1686_v15 = vadd.f32 1e-05, %v1684_v14 }
 0x8f7   : > { %v1683_v16 = vpop.xlane.xlu0 %1682 }
 0x8f8   : > { %2900 = vrsqrt.f32 %v1686_v15  ;;  %v1685_v17 = vmul.f32 0.0078125, %v1683_v16  ;;  %v2469_v15 = vld [vmem:[%s760_s26] ss:$0 sm:$0xff] }
 0x8fa   : > { %v1687_v18 = vadd.f32 1e-05, %v1685_v17  ;;  %v2470_v17 = vld [vmem:[%s763_s23] ss:$0 sm:$0xff] }
 0x8fc   : > { %2902 = vrsqrt.f32 %v1687_v18 }
 0x905   : > { %v2901_v5 = vpop.eup %2900 }
 0x906   : > { %v1690_v19 = vmul.f32 %v2901_v5, %v3780_v47 }
 0x908   : > { %v1699_v23 = vmul.f32 %v2434_v20, %v1690_v19 }
 0x909   : > { %v2903_v21 = vpop.eup %2902 }
 0x90a   : > { %v1691_v22 = vmul.f32 %v2903_v21, %v3784_v49  ;;  %v1708_v28 = vadd.f32 %v2435_v24, %v1699_v23 }
 0x90c   : > { %v1700_v27 = vmul.f32 %v2434_v20, %v1691_v22 }
 0x90e   : > { %v1709_v29 = vadd.f32 %v2435_v24, %v1700_v27 }
 0x910   : > { %v1710_v30 = vpack.c.bf16 %v1709_v29, %v1708_v28 }
 0x912   : > { %1852 = vmatmul.mubr.bf16.vlgmr.msra.gmra.mxu1 %v1710_v30 }
 0x9d2   : > { %v1853_v57 = vpop.f32.mrf.mxu1 }
 0x9d3   : > { %v1854_v47 = vadd.f32 %v1853_v57, %v1732_v42 }
 0x9d4   : > { %v1855_v43 = vpop.f32.mrf.mxu1 }
 0x9d5   : > { %v1856_v45 = vadd.f32 %v1855_v43, %v1736_v41  ;;  %v1862_v51 = vmax.f32 %v1854_v47, 0.0 }
 0x9d6   : > { %v1857_v44 = vpop.f32.mrf.mxu1 }
 0x9d7   : > { %v1858_v46 = vadd.f32 %v1857_v44, %v1732_v42  ;;  %v1863_v49 = vmax.f32 %v1856_v45, 0.0 }
 0x9d8   : > { %v1859_v25 = vpop.f32.mrf.mxu1 }
 0x9d9   : > { %v1860_v48 = vadd.f32 %v1859_v25, %v1736_v41  ;;  %v1864_v26 = vmax.f32 %v1858_v46, 0.0 }
 0x9db   : > { %v1865_v50 = vmax.f32 %v1860_v48, 0.0  ;;  %v1866_v53 = vpack.c.bf16 %v1864_v26, %v1862_v51 }
 0x9dd   : > { %v1867_v52 = vpack.c.bf16 %v1865_v50, %v1863_v49 }
 0x9df   : > { %2035 = vmatprep.mubr.bf16.mxu0 %v1867_v52 }
 0x9e0   : > { %2036 = vmatmul.mubr.bf16.vlgmr.msra.gmra.mxu0 %v1866_v53 }
 0xaa0   : > { %v2532_v33 = vpop.f32.mrf.mxu0 }
 0xaa2   : > { %v2533_v40 = vpop.f32.mrf.mxu0 }
 0xaa3   : > { %v2534_v54 = vadd.f32 %v2533_v40, %v2532_v33 }
 0xaa4   : > { %v2535_v55 = vpop.f32.mrf.mxu0 }
 0xaa5   : > { %v2038_v56 = vadd.f32 %v2534_v54, %v2452_v32 }
 0xaa6   : > { %v2536_v58 = vpop.f32.mrf.mxu0 }
 0xaa7   : > { %v2537_v59 = vadd.f32 %v2536_v58, %v2535_v55  ;;  %v2044_v4 = vadd.f32 %v2038_v56, %v1708_v28 }
 0xaa9   : > { %v2041_v60 = vadd.f32 %v2537_v59, %v2452_v32  ;;  %2046 = vadd.xlane.f32.xlu0 %v2044_v4 }
 0xaab   : > { %v2045_v61 = vadd.f32 %v2041_v60, %v1709_v29 }
 0xaad   : > { %2048 = vadd.xlane.f32.xlu1 %v2045_v61 }
 0xb32   : > { %v2047_v62 = vpop.xlane.xlu0 %2046 }
 0xb33   : > { %v2050_v63 = vmul.f32 0.0078125, %v2047_v62 }
 0xb35   : > { %v2052_v0 = vsub.f32 %v2044_v4, %v2050_v63 }
 0xb36   : > { %v2049_v1 = vpop.xlane.xlu1 %2048 }
 0xb37   : > { %v2051_v2 = vmul.f32 0.0078125, %v2049_v1  ;;  %v2054_v3 = vmul.f32 %v2052_v0, %v2052_v0 }
 0xb39   : > { %v2053_v6 = vsub.f32 %v2045_v61, %v2051_v2  ;;  %2056 = vadd.xlane.f32.xlu0 %v2054_v3 }
 0xb3b   : > { %v2055_v7 = vmul.f32 %v2053_v6, %v2053_v6 }
 0xb3d   : > { %2058 = vadd.xlane.f32.xlu1 %v2055_v7 }
 0xbc2   : > { %v2057_v8 = vpop.xlane.xlu0 %2056 }
 0xbc3   : > { %v2060_v9 = vmul.f32 0.0078125, %v2057_v8 }
 0xbc5   : > { %v2062_v10 = vadd.f32 1e-05, %v2060_v9 }
 0xbc6   : > { %v2059_v11 = vpop.xlane.xlu1 %2058 }
 0xbc7   : > { %2904 = vrsqrt.f32 %v2062_v10  ;;  %v2061_v12 = vmul.f32 0.0078125, %v2059_v11 }
 0xbc9   : > { %v2063_v13 = vadd.f32 1e-05, %v2061_v12 }
 0xbcb   : > { %2906 = vrsqrt.f32 %v2063_v13 }
 0xbd4   : > { %v2905_v14 = vpop.eup %2904 }
 0xbd5   : > { %v2066_v16 = vmul.f32 %v2905_v14, %v2052_v0 }
 0xbd7   : > { %v2075_v18 = vmul.f32 %v2469_v15, %v2066_v16 }
 0xbd8   : > { %v2907_v5 = vpop.eup %2906 }
 0xbd9   : > { %v2084_v19 = vadd.f32 %v2470_v17, %v2075_v18  ;;  %v2067_v20 = vmul.f32 %v2907_v5, %v2053_v6 }
 0xbdb   : > { %2086 = vst [vmem:[#allocation2] sm:$0xff] %v2084_v19  ;;  %v2076_v21 = vmul.f32 %v2469_v15, %v2067_v20  ;;  %2091 = sbr.rel (%p2471_p0) target bundleno = 3041 (0xbe1), region = 104 }
 0xbdd   : > { %v2085_v22 = vadd.f32 %v2470_v17, %v2076_v21 }
 0xbdf   : > { %2087 = vst [vmem:[#allocation2 + $0x8] sm:$0xff] %v2085_v22 }
 0xbe0   : > { %2092 = vst [vmem:[%s3618_s27] sm:$0xff] %v2084_v19  ;;  %2093 = vst [vmem:[%s3618_s27 + $0x8] sm:$0xff] %v2085_v22 }
 0xbe1 PF: > { %s4027_s26 = sld [smem:[#allocation26_spill]]  ;;  %s2108_s21 = sshll.u32 %s3618_s27, 4  ;;  %s3860_s21 = int_to_ptr.vmem [resolvable:$true] %s2108_s21 }
 0xbe2   : > { %s4028_s2 = sld [smem:[#allocation48_spill]]  ;;  %s2095_s7 = scalar_lea.sflag [#allocation5], %s3546_s8 }
 0xbe3   : > { %s3076_s20 = scalar_lea.vmem %s3860_s21, 256  ;;  %p4029_p2 = scmp.ne.s32.totalorder %s3996_s3, 0 }
 0xbe4   : > { %p3077_p12 = scmp.ne.s32.totalorder %s3860_s21, %s3076_s20  ;;  %s3228_s22 = smov [#allocation14]  }
 0xbe5   : > { %s3080_s19 = sshll.u32 %s3228_s22, 4  ;;  %s3081_s19 = int_to_ptr.vmem [resolvable:$false] %s3080_s19 }
 0xbe6   : > { %p3078_p8 = pnand %p3077_p12, %p4029_p2  ;;  %s3082_s24 = scalar_lea.vmem %s3081_s19, 512 }
 0xbe7   : > { %s2481_s28 = sshll.u32 %s4027_s26, 8  ;;  %p3083_p9 = scmp.lt.s32.totalorder %s3860_s21, %s3081_s19 }
 0xbe8   : > { %s3857_s29 = scalar_lea.hbm %s4028_s2, %s2481_s28  ;;  %p3079_p3 = pneg %p3078_p8 }
 0xbe9   : > { %p3084_p11 = scmp.lt.s32.totalorder %s3082_s24, %s3076_s20 }
 0xbeb   : > { %p3085_p4 = por %p3084_p11, %p3083_p9 }
 0xbed   : > { %p3086_p1 = pnand %p3085_p4, %p3079_p3 }
 0xbef   : > { %3089 = shalt.err (!%p3086_p1)
}
 0xbf0   : > { %s3090_s27 = scalar_lea.hbm %s3857_s29, 256  ;;  %s3094_s25 = scalar_lea.hbm %s4028_s2, 512 }
 0xbf1   : > { %p3091_p10 = scmp.ne.s32.totalorder %s3857_s29, %s3090_s27  ;;  %p3095_p5 = scmp.lt.s32.totalorder %s3857_s29, %s4028_s2 }
 0xbf2   : > { %p3096_p7 = scmp.lt.s32.totalorder %s3094_s25, %s3090_s27 }
 0xbf3   : > { %p3092_p13 = pnand %p3091_p10, %p4029_p2 }
 0xbf4   : > { %p3097_p0 = por %p3096_p7, %p3095_p5 }
 0xbf5   : > { %p3093_p6 = pneg %p3092_p13 }
 0xbf7   : > { %p3098_p12 = pnand %p3097_p0, %p3093_p6 }
 0xbf9   : > { %3101 = shalt.err (!%p3098_p12)
}
 0xbfa   : > { %s3229_s14 = smov 128   ;;  %s3230_s13 = smov 8  }
 0xbfb   : > { %2644 = dma.vmem_to_hbm [thread:$0]  (%p4029_p2), %s3860_s21, 256, %s3857_s29, %s2095_s7, %s3229_s14, %s3229_s14, %s3230_s13  }
 0xbfc PF: > { %s4030_s11 = sld [smem:[#allocation29_spill]] }
 0xbfd   : > { %s4031_s30 = sld [smem:[#allocation22_spill]] }
 0xbfe   : > { %s4032_s16 = sld [smem:[#allocation34_spill]] }
 0xc02   : > { %p2670_p8 = scmp.ge.s32.totalorder %s4030_s11, 2 }
 0xc03   : > { %s2123_s17 = sand.u32 1, %s4031_s30  }
 0xc04   : > { %p4033_p3 = scmp.ne.s32.totalorder %s4032_s16, 0  ;;  %s2124_s18 = scalar_lea.sflag [#allocation5], %s2123_s17 }
 0xc06   : > { %p2666_p9 = pnand %p2670_p8, %p4033_p3 }
 0xc08   : > { %p2667_p11 = pneg %p2666_p9 }
 0xc0a   : > { %3163 = dma.done.wait (%p2667_p11), %s2124_s18, 256  }
 0xc0b   : > { %3165 = vsyncadd (%p2667_p11), %s2124_s18, 4294967040  ;;  %s38_s18 = sadd.s32 1, %s4030_s11   ;;  %s4034_s25 = sld [smem:[#allocation20_spill]] }
 0xc0c   : > { %p35_p4 = scmp.ge.s32.totalorder %s38_s18, 6   ;;  %s4035_s26 = sld [smem:[#allocation21_spill]] }
 0xc0d   : > { %s4036_s27 = sld [smem:[#allocation32_spill]] }
 0xc0e   : > { %s4037_s28 = sld [smem:[#allocation23_spill]] }
 0xc0f   : > { %s4038_s29 = sld [smem:[#allocation24_spill]] }
 0xc10   : > { %s4039_s30 = sld [smem:[#allocation33_spill]]  ;;  %37 = sbr.rel (!%p35_p4) target bundleno = 30 (0x1e), region = 207 }
 0xc11   : > { %s4040_s14 = sld [smem:[#allocation27_spill]] }
 0xc12   : > { %s4041_s15 = sld [smem:[#allocation28_spill]] }
 0xc13   : > { %s4042_s16 = sld [smem:[#allocation30_spill]] }
 0xc14   : > { %s4043_s17 = sld [smem:[#allocation31_spill]] }
 0xc15   :  { %2129 = vsyncpa [#allocation4], 1 }
 0xc16   :  { %2131 = vsyncpa [#allocation4 + $0x1], 1 }
 0xc17   :  { %2132 = vsyncpa [#allocation7], 1 }
 0xc18   :  { %2134 = vsyncpa [#allocation7 + $0x1], 1 }
 0xc19   :  { %2135 = vsyncpa [#allocation10], 1 }
 0xc1a   :  { %2137 = vsyncpa [#allocation10 + $0x1], 1 }
 0xc1b   :  { %2138 = vsyncpa [#allocation13], 1 }
 0xc1c   :  { %2140 = vsyncpa [#allocation13 + $0x1], 1 }
 0xc1d   :  { %2141 = vsyncpa [#allocation5], 1 }
 0xc1e   :  { %2143 = vsyncpa [#allocation5 + $0x1], 1 }

</bundles_post_ra>
